<compile_context>
chip_gen: v7x
topology: tpu7x:2x2x1
jax: 0.10.0
libtpu: 0.0.40
codegen_flags: <defaults>
</compile_context>

<pallas_src>
import functools
import math

import jax
import jax.numpy as jnp
from jax.experimental import pallas as pl
from jax.experimental.pallas import tpu as pltpu

# ----------------------------- model config ---------------------------------
NUM_LAYERS = 2
EMB_SIZE = 32          # d_model
NHEAD = 4
HEAD_DIM = EMB_SIZE // NHEAD
DIM_FF = 64            # dim_feedforward (kept small for the test)
NUM_CLASSES = 10
OUT_PAD = 128          # lane-dense padded classifier output width
PATCH_LEN = 4
CMD_VOCAB = 16
CMD_EMB = 8
POS_DIM = 2

BATCH = 2
RAW_SEQ = 32                       # raw token sequence length
N_PATCH = RAW_SEQ // PATCH_LEN     # 8 patch tokens
SEQ = N_PATCH + 1                  # +1 for CLS token (= 9)
SEQ_PAD = 16                       # sublane-aligned padded sequence length

LN_EPS = 1e-5

# ---- packed encoder-weight slab layout: per layer (ENC_W_ROWS, ENC_W_COLS) --
_QKV_R0 = 0                        # rows 0:32,   lanes 0:96  -> [Wq | Wk | Wv]
_WO_R0 = EMB_SIZE                  # rows 32:64,  lanes 0:32  -> Wo
_W1_R0 = 2 * EMB_SIZE              # rows 64:96,  lanes 0:64  -> W1
_W2_R0 = 3 * EMB_SIZE              # rows 96:160, lanes 0:32  -> W2
ENC_W_ROWS = 3 * EMB_SIZE + DIM_FF           # 160
ENC_W_COLS = 3 * EMB_SIZE                    # 96

# ---- packed per-layer vector rows in `vecs` (shape (L, 8, 128)) -------------
_V_BQKV, _V_BO, _V_LN1W, _V_LN1B, _V_LN2W, _V_LN2B, _V_B1, _V_B2 = range(8)

# ---- packed classifier-head slab (HEAD_ROWS, OUT_PAD) -----------------------
_H_CW1_R0 = 0                      # rows 0:32,   lanes 0:64  -> cw1
_H_CW2_R0 = EMB_SIZE               # rows 32:96,  lanes 0:128 -> cw2 (zero-padded)
_H_CB1_R = EMB_SIZE + DIM_FF       # row 96,      lanes 0:64  -> cb1
_H_CB2_R = _H_CB1_R + 8            # row 104,     lanes 0:128 -> cb2
HEAD_ROWS = _H_CB2_R + 8           # 112


# ----------------------------- Pallas kernel --------------------------------
def _layer_norm(x, w, b):
    mean = jnp.mean(x, axis=-1, keepdims=True)
    var = jnp.mean((x - mean) ** 2, axis=-1, keepdims=True)
    return (x - mean) * jax.lax.rsqrt(var + LN_EPS) * w + b


def fused_model_kernel(x_ref, enc_w_ref, vecs_ref, head_ref, o_ref, *,
                       seq, nhead, num_layers):
    """Both pre-norm encoder layers + classifier head for ONE batch element.

    x_ref:     (1, SEQ_PAD, E)  padded token block (row 0 = CLS).
    enc_w_ref: (L, 160, 96)     packed [Wq|Wk|Wv ; Wo ; W1 ; W2].
    vecs_ref:  (L, 8, 128)      packed biases + LayerNorm params.
    head_ref:  (112, 128)       packed classifier [cw1 ; cw2 ; cb1 ; cb2].
    o_ref:     (1, 8, 128)      lane/sublane-dense output tile (row 0 = logits).
    """
    E = EMB_SIZE
    dh = E // nhead
    scale = 1.0 / math.sqrt(dh)

    xr = x_ref[0].astype(jnp.float32)                       # (SEQ_PAD, E)
    s_pad = xr.shape[0]

    # additive key mask: padded key columns (>= seq) never attended to
    col = jax.lax.broadcasted_iota(jnp.int32, (s_pad, s_pad), 1)
    key_mask = jnp.where(col < seq, 0.0, -1e9).astype(jnp.float32)

    for l in range(num_layers):                             # static, L=2
        # ---- pre-norm self-attention block: x = x + MHA(LN1(x)) ----
        ln1w = vecs_ref[l, _V_LN1W:_V_LN1W + 1, :E]
        ln1b = vecs_ref[l, _V_LN1B:_V_LN1B + 1, :E]
        xn = _layer_norm(xr, ln1w, ln1b)                    # (S, E)

        wqkv = enc_w_ref[l, _QKV_R0:_QKV_R0 + E, :3 * E]    # (E, 3E) fused
        bqkv = vecs_ref[l, _V_BQKV:_V_BQKV + 1, :3 * E]     # (1, 3E)
        qkv = jnp.dot(xn, wqkv, preferred_element_type=jnp.float32) + bqkv

        attn = jnp.zeros((s_pad, E), jnp.float32)
        for h in range(nhead):                              # static, H=4
            qh = qkv[:, h * dh:(h + 1) * dh]                # (S, Dh)
            kh = qkv[:, E + h * dh:E + (h + 1) * dh]
            vh = qkv[:, 2 * E + h * dh:2 * E + (h + 1) * dh]
            # scores = qh @ kh^T without an explicit transpose
            s = jax.lax.dot_general(qh, kh, (((1,), (1,)), ((), ())),
                                    preferred_element_type=jnp.float32)
            s = s * scale + key_mask                        # mask padded keys
            s = s - jnp.max(s, axis=-1, keepdims=True)
            e = jnp.exp(s)
            p = e * pl.reciprocal(jnp.sum(e, axis=-1, keepdims=True),
                                  approx=True)
            ctx_h = jnp.dot(p, vh, preferred_element_type=jnp.float32)  # (S, Dh)
            # fold the head directly through the matching row-slice of Wo
            wo_h = enc_w_ref[l, _WO_R0 + h * dh:_WO_R0 + (h + 1) * dh, :E]
            attn = attn + jnp.dot(ctx_h, wo_h,
                                  preferred_element_type=jnp.float32)

        bo = vecs_ref[l, _V_BO:_V_BO + 1, :E]
        xr = xr + attn + bo

        # ---- pre-norm feed-forward block: x = x + W2 relu(W1 LN2(x)+b1)+b2 --
        ln2w = vecs_ref[l, _V_LN2W:_V_LN2W + 1, :E]
        ln2b = vecs_ref[l, _V_LN2B:_V_LN2B + 1, :E]
        xn2 = _layer_norm(xr, ln2w, ln2b)
        w1 = enc_w_ref[l, _W1_R0:_W1_R0 + E, :DIM_FF]
        b1 = vecs_ref[l, _V_B1:_V_B1 + 1, :DIM_FF]
        h1 = jnp.maximum(
            jnp.dot(xn2, w1, preferred_element_type=jnp.float32) + b1, 0.0)
        w2 = enc_w_ref[l, _W2_R0:_W2_R0 + DIM_FF, :E]
        b2 = vecs_ref[l, _V_B2:_V_B2 + 1, :E]
        xr = xr + jnp.dot(h1, w2, preferred_element_type=jnp.float32) + b2

    # ---- classifier head: CLS is row 0; use the aligned 8-row prefix ----
    cls8 = xr[0:8, :]                                       # (8, E), row 0 = CLS
    cw1 = head_ref[_H_CW1_R0:_H_CW1_R0 + E, :DIM_FF]
    cb1 = head_ref[_H_CB1_R:_H_CB1_R + 1, :DIM_FF]
    h = jnp.dot(cls8, cw1, preferred_element_type=jnp.float32) + cb1   # (8, FF)
    g = 0.5 * h * (1.0 + jax.lax.erf(h / math.sqrt(2.0)))              # exact GELU
    cw2 = head_ref[_H_CW2_R0:_H_CW2_R0 + DIM_FF, :]
    cb2 = head_ref[_H_CB2_R:_H_CB2_R + 1, :]
    out = jnp.dot(g, cw2, preferred_element_type=jnp.float32) + cb2    # (8, 128)
    o_ref[0] = out.astype(o_ref.dtype)                      # lane+sublane dense


# ----------------------------- Pallas wrapper --------------------------------
def run_fused_model(x, p):
    """x: (B, S, E) -> logits (B, NUM_CLASSES). One fused pallas_call."""
    B, S, E = x.shape
    # zero-pad sequence to a sublane-aligned length (padded keys are masked)
    x_pad = jnp.zeros((B, SEQ_PAD, E), x.dtype).at[:, :S, :].set(x)

    enc_w, vecs, head = p["enc_w"], p["vecs"], p["head"]
    out_pad = pl.pallas_call(
        functools.partial(fused_model_kernel, seq=S, nhead=NHEAD,
                          num_layers=NUM_LAYERS),
        out_shape=jax.ShapeDtypeStruct((B, 8, OUT_PAD), jnp.float32),
        grid=(B,),                                   # one batch element per step
        in_specs=[
            pl.BlockSpec((1, SEQ_PAD, E), lambda b: (b, 0, 0)),
            pl.BlockSpec(enc_w.shape, lambda b: (0, 0, 0)),
            pl.BlockSpec(vecs.shape, lambda b: (0, 0, 0)),
            pl.BlockSpec(head.shape, lambda b: (0, 0)),
        ],
        out_specs=pl.BlockSpec((1, 8, OUT_PAD), lambda b: (b, 0, 0)),
        compiler_params=pltpu.CompilerParams(
            dimension_semantics=("parallel",)),      # 2-core split on v7x
    )(x_pad, enc_w, vecs, head)
    return out_pad[:, 0, :NUM_CLASSES]


# ----------------------------- parameter init --------------------------------
def init_params(key):
    def nrm(k, shape, scale=0.02):
        return (scale * jax.random.normal(k, shape)).astype(jnp.float32)

    keys = iter(jax.random.split(key, 128))

    def stack_nrm(shape):
        return jnp.stack([nrm(next(keys), shape) for _ in range(NUM_LAYERS)])

    params = {
        # embedding (PatchedSegmentEmbedding approximation)
        "cmd_table": nrm(next(keys), (CMD_VOCAB, CMD_EMB)),
        "patch_w": nrm(next(keys), (PATCH_LEN * (CMD_EMB + POS_DIM), EMB_SIZE)),
        "patch_b": jnp.zeros((EMB_SIZE,), jnp.float32),
        # learned positional encoding
        "pos_table": nrm(next(keys), (N_PATCH, EMB_SIZE)),
        # cls token (PyTorch init: zeros)
        "cls_token": jnp.zeros((1, 1, EMB_SIZE), jnp.float32),
    }

    # encoder weights (x @ W form), then packed into one lane/sublane-dense slab
    wq = stack_nrm((EMB_SIZE, EMB_SIZE))
    wk = stack_nrm((EMB_SIZE, EMB_SIZE))
    wv = stack_nrm((EMB_SIZE, EMB_SIZE))
    wo = stack_nrm((EMB_SIZE, EMB_SIZE))
    w1 = stack_nrm((EMB_SIZE, DIM_FF))
    w2 = stack_nrm((DIM_FF, EMB_SIZE))

    enc_w = jnp.zeros((NUM_LAYERS, ENC_W_ROWS, ENC_W_COLS), jnp.float32)
    enc_w = enc_w.at[:, _QKV_R0:_QKV_R0 + EMB_SIZE, :3 * EMB_SIZE].set(
        jnp.concatenate([wq, wk, wv], axis=-1))
    enc_w = enc_w.at[:, _WO_R0:_WO_R0 + EMB_SIZE, :EMB_SIZE].set(wo)
    enc_w = enc_w.at[:, _W1_R0:_W1_R0 + EMB_SIZE, :DIM_FF].set(w1)
    enc_w = enc_w.at[:, _W2_R0:_W2_R0 + DIM_FF, :EMB_SIZE].set(w2)
    params["enc_w"] = enc_w

    # per-layer biases / LayerNorm params, one packed (L, 8, 128) tensor
    # (biases zero, LN weight 1, LN bias 0 -> PyTorch default init)
    vecs = jnp.zeros((NUM_LAYERS, 8, OUT_PAD), jnp.float32)
    vecs = vecs.at[:, _V_LN1W, :EMB_SIZE].set(1.0)
    vecs = vecs.at[:, _V_LN2W, :EMB_SIZE].set(1.0)
    params["vecs"] = vecs

    # classifier head, packed; final weights zero-padded to lane-dense 128 cols
    cw1 = nrm(next(keys), (EMB_SIZE, DIM_FF))
    cw2 = nrm(next(keys), (DIM_FF, NUM_CLASSES))
    head = jnp.zeros((HEAD_ROWS, OUT_PAD), jnp.float32)
    head = head.at[_H_CW1_R0:_H_CW1_R0 + EMB_SIZE, :DIM_FF].set(cw1)
    head = head.at[_H_CW2_R0:_H_CW2_R0 + DIM_FF, :NUM_CLASSES].set(cw2)
    # cb1 (row 96) / cb2 (row 104) stay zero (matches previous version)
    params["head"] = head
    return params


# ----------------------------- forward pass -----------------------------------
def font_classifier_forward(params, cmd_tokens, pos_tokens):
    """cmd_tokens: (B, L) int32, pos_tokens: (B, L, POS_DIM) float32."""
    B, L = cmd_tokens.shape

    # --- src_tok_emb: patched segment embedding (plain-JAX glue) ---
    tok = params["cmd_table"][cmd_tokens]                        # (B, L, CMD_EMB)
    feat = jnp.concatenate([tok, pos_tokens], axis=-1)           # (B, L, CMD_EMB+POS_DIM)
    patches = feat.reshape(B, L // PATCH_LEN, PATCH_LEN * (CMD_EMB + POS_DIM))
    emb = patches @ params["patch_w"] + params["patch_b"]        # (B, Np, E)

    # --- positional_encoding: learned additive table ---
    emb = emb + params["pos_table"][None, :, :]

    # --- prepend CLS token ---
    cls_tokens = jnp.broadcast_to(params["cls_token"], (B, 1, EMB_SIZE))
    x = jnp.concatenate([cls_tokens, emb], axis=1)               # (B, S, E)

    # --- fused encoder layers + classifier head (single Pallas kernel) ---
    return run_fused_model(x, params)                            # (B, num_classes)


# ----------------------------- main -------------------------------------------
if __name__ == "__main__":
    key = jax.random.PRNGKey(0)
    k_param, k_cmd, k_pos = jax.random.split(key, 3)

    params = init_params(k_param)
    cmd_tokens = jax.random.randint(k_cmd, (BATCH, RAW_SEQ), 0, CMD_VOCAB,
                                    dtype=jnp.int32)
    pos_tokens = jax.random.normal(k_pos, (BATCH, RAW_SEQ, POS_DIM),
                                   dtype=jnp.float32)

    forward = jax.jit(font_classifier_forward)
    out = forward(params, cmd_tokens, pos_tokens)
    out = jax.block_until_ready(out)
    assert out.shape == (BATCH, NUM_CLASSES), out.shape
    assert bool(jnp.all(jnp.isfinite(out)))
    print("KERNEL_OK")
</pallas_src>

<mosaic_0001>
module attributes {stable_mosaic.version = 11 : i64} {
  func.func @fused_model_kernel(%arg0: i32, %arg1: memref<1x16x32xf32, #tpu.memory_space<vmem>>, %arg2: memref<2x160x96xf32, #tpu.memory_space<vmem>>, %arg3: memref<2x8x128xf32, #tpu.memory_space<vmem>>, %arg4: memref<112x128xf32, #tpu.memory_space<vmem>>, %arg5: memref<1x8x128xf32, #tpu.memory_space<vmem>>) attributes {dimension_semantics = [#tpu.dimension_semantics<parallel>], iteration_bounds = array<i64: 2>, scalar_prefetch = 0 : i64, scratch_operands = 0 : i64, tpu.core_type = #tpu.core_type<tc>, window_params = [{transform_indices = @transform_0, window_bounds = array<i64: 1, 16, 32>}, {pipeline_mode = #tpu.pipeline_mode<synchronous>, transform_indices = @transform_1, window_bounds = array<i64: 2, 160, 96>}, {pipeline_mode = #tpu.pipeline_mode<synchronous>, transform_indices = @transform_2, window_bounds = array<i64: 2, 8, 128>}, {pipeline_mode = #tpu.pipeline_mode<synchronous>, transform_indices = @transform_3, window_bounds = array<i64: 112, 128>}, {transform_indices = @transform_4, window_bounds = array<i64: 1, 8, 128>}]} {
    %c0 = arith.constant 0 : index
    %c0_0 = arith.constant 0 : index
    %c0_1 = arith.constant 0 : index
    %0 = vector.load %arg1[%c0, %c0_0, %c0_1] : memref<1x16x32xf32, #tpu.memory_space<vmem>>, vector<1x16x32xf32>
    %1 = vector.shape_cast %0 : vector<1x16x32xf32> to vector<16x32xf32>
    %2 = tpu.iota {dimensions = array<i32: 1>} : vector<16x16xi32>
    %c9_i32 = arith.constant 9 : i32
    %3 = vector.broadcast %c9_i32 : i32 to vector<16x16xi32>
    %4 = arith.cmpi slt, %2, %3 : vector<16x16xi32>
    %cst = arith.constant 0.000000e+00 : f32
    %cst_2 = arith.constant -1.000000e+09 : f32
    %5 = vector.broadcast %cst : f32 to vector<16x16xf32>
    %6 = vector.broadcast %cst_2 : f32 to vector<16x16xf32>
    %7 = arith.select %4, %5, %6 : vector<16x16xi1>, vector<16x16xf32>
    %c0_3 = arith.constant 0 : index
    %c2 = arith.constant 2 : index
    %c0_4 = arith.constant 0 : index
    %8 = vector.load %arg3[%c0_3, %c2, %c0_4] : memref<2x8x128xf32, #tpu.memory_space<vmem>>, vector<1x1x32xf32>
    %9 = vector.shape_cast %8 : vector<1x1x32xf32> to vector<1x32xf32>
    %c0_5 = arith.constant 0 : index
    %c3 = arith.constant 3 : index
    %c0_6 = arith.constant 0 : index
    %10 = vector.load %arg3[%c0_5, %c3, %c0_6] : memref<2x8x128xf32, #tpu.memory_space<vmem>>, vector<1x1x32xf32>
    %11 = vector.shape_cast %10 : vector<1x1x32xf32> to vector<1x32xf32>
    %cst_7 = arith.constant dense<0.000000e+00> : vector<16xf32>
    %12 = vector.multi_reduction <add>, %1, %cst_7 [1] : vector<16x32xf32> to vector<16xf32>
    %13 = vector.shape_cast %12 : vector<16xf32> to vector<16x1xf32>
    %cst_8 = arith.constant 3.200000e+01 : f32
    %14 = vector.broadcast %cst_8 : f32 to vector<16x1xf32>
    %15 = arith.divf %13, %14 : vector<16x1xf32>
    %16 = vector.broadcast %15 : vector<16x1xf32> to vector<16x32xf32>
    %17 = arith.subf %1, %16 : vector<16x32xf32>
    %18 = arith.mulf %17, %17 : vector<16x32xf32>
    %cst_9 = arith.constant dense<0.000000e+00> : vector<16xf32>
    %19 = vector.multi_reduction <add>, %18, %cst_9 [1] : vector<16x32xf32> to vector<16xf32>
    %20 = vector.shape_cast %19 : vector<16xf32> to vector<16x1xf32>
    %cst_10 = arith.constant 3.200000e+01 : f32
    %21 = vector.broadcast %cst_10 : f32 to vector<16x1xf32>
    %22 = arith.divf %20, %21 : vector<16x1xf32>
    %23 = vector.broadcast %15 : vector<16x1xf32> to vector<16x32xf32>
    %24 = arith.subf %1, %23 : vector<16x32xf32>
    %cst_11 = arith.constant 9.99999974E-6 : f32
    %25 = vector.broadcast %cst_11 : f32 to vector<16x1xf32>
    %26 = arith.addf %22, %25 : vector<16x1xf32>
    %27 = math.rsqrt %26 : vector<16x1xf32>
    %28 = vector.broadcast %27 : vector<16x1xf32> to vector<16x32xf32>
    %29 = arith.mulf %24, %28 : vector<16x32xf32>
    %30 = vector.broadcast %9 : vector<1x32xf32> to vector<16x32xf32>
    %31 = arith.mulf %29, %30 : vector<16x32xf32>
    %32 = vector.broadcast %11 : vector<1x32xf32> to vector<16x32xf32>
    %33 = arith.addf %31, %32 : vector<16x32xf32>
    %c0_12 = arith.constant 0 : index
    %c0_13 = arith.constant 0 : index
    %c0_14 = arith.constant 0 : index
    %34 = vector.load %arg2[%c0_12, %c0_13, %c0_14] : memref<2x160x96xf32, #tpu.memory_space<vmem>>, vector<1x32x96xf32>
    %35 = vector.shape_cast %34 : vector<1x32x96xf32> to vector<32x96xf32>
    %c0_15 = arith.constant 0 : index
    %c0_16 = arith.constant 0 : index
    %c0_17 = arith.constant 0 : index
    %36 = vector.load %arg3[%c0_15, %c0_16, %c0_17] : memref<2x8x128xf32, #tpu.memory_space<vmem>>, vector<1x1x96xf32>
    %37 = vector.shape_cast %36 : vector<1x1x96xf32> to vector<1x96xf32>
    %cst_18 = arith.constant dense<0.000000e+00> : vector<16x96xf32>
    %38 = tpu.matmul %33, %35, %cst_18 {dimension_numbers = #tpu.dot_dimension_numbers<[1], [0], [0], [1], [0, 0, 1, 1], [], []>} : vector<16x32xf32>, vector<32x96xf32>, vector<16x96xf32> -> vector<16x96xf32>
    %39 = vector.broadcast %37 : vector<1x96xf32> to vector<16x96xf32>
    %40 = arith.addf %38, %39 : vector<16x96xf32>
    %cst_19 = arith.constant 0.000000e+00 : f32
    %41 = vector.broadcast %cst_19 : f32 to vector<16x32xf32>
    %42 = vector.extract_strided_slice %40 {offsets = [0, 0], sizes = [16, 8], strides = [1, 1]} : vector<16x96xf32> to vector<16x8xf32>
    %43 = vector.extract_strided_slice %40 {offsets = [0, 32], sizes = [16, 8], strides = [1, 1]} : vector<16x96xf32> to vector<16x8xf32>
    %44 = vector.extract_strided_slice %40 {offsets = [0, 64], sizes = [16, 8], strides = [1, 1]} : vector<16x96xf32> to vector<16x8xf32>
    %cst_20 = arith.constant dense<0.000000e+00> : vector<16x16xf32>
    %45 = tpu.matmul %42, %43, %cst_20 {dimension_numbers = #tpu.dot_dimension_numbers<[1], [1], [0], [0], [0, 0, 1, 0], [], []>} : vector<16x8xf32>, vector<16x8xf32>, vector<16x16xf32> -> vector<16x16xf32>
    %cst_21 = arith.constant 0.353553385 : f32
    %46 = vector.broadcast %cst_21 : f32 to vector<16x16xf32>
    %47 = arith.mulf %45, %46 : vector<16x16xf32>
    %48 = arith.addf %47, %7 : vector<16x16xf32>
    %cst_22 = arith.constant dense<0xFF800000> : vector<16xf32>
    %49 = vector.multi_reduction <maximumf>, %48, %cst_22 [1] : vector<16x16xf32> to vector<16xf32>
    %50 = vector.shape_cast %49 : vector<16xf32> to vector<16x1xf32>
    %51 = vector.broadcast %50 : vector<16x1xf32> to vector<16x16xf32>
    %52 = arith.subf %48, %51 : vector<16x16xf32>
    %53 = math.exp %52 : vector<16x16xf32>
    %cst_23 = arith.constant dense<0.000000e+00> : vector<16xf32>
    %54 = vector.multi_reduction <add>, %53, %cst_23 [1] : vector<16x16xf32> to vector<16xf32>
    %55 = vector.shape_cast %54 : vector<16xf32> to vector<16x1xf32>
    %56 = tpu.reciprocal %55 {approx = true} : vector<16x1xf32> -> vector<16x1xf32>
    %57 = vector.broadcast %56 : vector<16x1xf32> to vector<16x16xf32>
    %58 = arith.mulf %53, %57 : vector<16x16xf32>
    %cst_24 = arith.constant dense<0.000000e+00> : vector<16x8xf32>
    %59 = tpu.matmul %58, %44, %cst_24 {dimension_numbers = #tpu.dot_dimension_numbers<[1], [0], [0], [1], [0, 0, 1, 1], [], []>} : vector<16x16xf32>, vector<16x8xf32>, vector<16x8xf32> -> vector<16x8xf32>
    %c0_25 = arith.constant 0 : index
    %c32 = arith.constant 32 : index
    %c0_26 = arith.constant 0 : index
    %60 = vector.load %arg2[%c0_25, %c32, %c0_26] : memref<2x160x96xf32, #tpu.memory_space<vmem>>, vector<1x8x32xf32>
    %61 = vector.shape_cast %60 : vector<1x8x32xf32> to vector<8x32xf32>
    %cst_27 = arith.constant dense<0.000000e+00> : vector<16x32xf32>
    %62 = tpu.matmul %59, %61, %cst_27 {dimension_numbers = #tpu.dot_dimension_numbers<[1], [0], [0], [1], [0, 0, 1, 1], [], []>} : vector<16x8xf32>, vector<8x32xf32>, vector<16x32xf32> -> vector<16x32xf32>
    %63 = arith.addf %41, %62 : vector<16x32xf32>
    %64 = vector.extract_strided_slice %40 {offsets = [0, 8], sizes = [16, 8], strides = [1, 1]} : vector<16x96xf32> to vector<16x8xf32>
    %65 = vector.extract_strided_slice %40 {offsets = [0, 40], sizes = [16, 8], strides = [1, 1]} : vector<16x96xf32> to vector<16x8xf32>
    %66 = vector.extract_strided_slice %40 {offsets = [0, 72], sizes = [16, 8], strides = [1, 1]} : vector<16x96xf32> to vector<16x8xf32>
    %cst_28 = arith.constant dense<0.000000e+00> : vector<16x16xf32>
    %67 = tpu.matmul %64, %65, %cst_28 {dimension_numbers = #tpu.dot_dimension_numbers<[1], [1], [0], [0], [0, 0, 1, 0], [], []>} : vector<16x8xf32>, vector<16x8xf32>, vector<16x16xf32> -> vector<16x16xf32>
    %cst_29 = arith.constant 0.353553385 : f32
    %68 = vector.broadcast %cst_29 : f32 to vector<16x16xf32>
    %69 = arith.mulf %67, %68 : vector<16x16xf32>
    %70 = arith.addf %69, %7 : vector<16x16xf32>
    %cst_30 = arith.constant dense<0xFF800000> : vector<16xf32>
    %71 = vector.multi_reduction <maximumf>, %70, %cst_30 [1] : vector<16x16xf32> to vector<16xf32>
    %72 = vector.shape_cast %71 : vector<16xf32> to vector<16x1xf32>
    %73 = vector.broadcast %72 : vector<16x1xf32> to vector<16x16xf32>
    %74 = arith.subf %70, %73 : vector<16x16xf32>
    %75 = math.exp %74 : vector<16x16xf32>
    %cst_31 = arith.constant dense<0.000000e+00> : vector<16xf32>
    %76 = vector.multi_reduction <add>, %75, %cst_31 [1] : vector<16x16xf32> to vector<16xf32>
    %77 = vector.shape_cast %76 : vector<16xf32> to vector<16x1xf32>
    %78 = tpu.reciprocal %77 {approx = true} : vector<16x1xf32> -> vector<16x1xf32>
    %79 = vector.broadcast %78 : vector<16x1xf32> to vector<16x16xf32>
    %80 = arith.mulf %75, %79 : vector<16x16xf32>
    %cst_32 = arith.constant dense<0.000000e+00> : vector<16x8xf32>
    %81 = tpu.matmul %80, %66, %cst_32 {dimension_numbers = #tpu.dot_dimension_numbers<[1], [0], [0], [1], [0, 0, 1, 1], [], []>} : vector<16x16xf32>, vector<16x8xf32>, vector<16x8xf32> -> vector<16x8xf32>
    %c0_33 = arith.constant 0 : index
    %c40 = arith.constant 40 : index
    %c0_34 = arith.constant 0 : index
    %82 = vector.load %arg2[%c0_33, %c40, %c0_34] : memref<2x160x96xf32, #tpu.memory_space<vmem>>, vector<1x8x32xf32>
    %83 = vector.shape_cast %82 : vector<1x8x32xf32> to vector<8x32xf32>
    %cst_35 = arith.constant dense<0.000000e+00> : vector<16x32xf32>
    %84 = tpu.matmul %81, %83, %cst_35 {dimension_numbers = #tpu.dot_dimension_numbers<[1], [0], [0], [1], [0, 0, 1, 1], [], []>} : vector<16x8xf32>, vector<8x32xf32>, vector<16x32xf32> -> vector<16x32xf32>
    %85 = arith.addf %63, %84 : vector<16x32xf32>
    %86 = vector.extract_strided_slice %40 {offsets = [0, 16], sizes = [16, 8], strides = [1, 1]} : vector<16x96xf32> to vector<16x8xf32>
    %87 = vector.extract_strided_slice %40 {offsets = [0, 48], sizes = [16, 8], strides = [1, 1]} : vector<16x96xf32> to vector<16x8xf32>
    %88 = vector.extract_strided_slice %40 {offsets = [0, 80], sizes = [16, 8], strides = [1, 1]} : vector<16x96xf32> to vector<16x8xf32>
    %cst_36 = arith.constant dense<0.000000e+00> : vector<16x16xf32>
    %89 = tpu.matmul %86, %87, %cst_36 {dimension_numbers = #tpu.dot_dimension_numbers<[1], [1], [0], [0], [0, 0, 1, 0], [], []>} : vector<16x8xf32>, vector<16x8xf32>, vector<16x16xf32> -> vector<16x16xf32>
    %cst_37 = arith.constant 0.353553385 : f32
    %90 = vector.broadcast %cst_37 : f32 to vector<16x16xf32>
    %91 = arith.mulf %89, %90 : vector<16x16xf32>
    %92 = arith.addf %91, %7 : vector<16x16xf32>
    %cst_38 = arith.constant dense<0xFF800000> : vector<16xf32>
    %93 = vector.multi_reduction <maximumf>, %92, %cst_38 [1] : vector<16x16xf32> to vector<16xf32>
    %94 = vector.shape_cast %93 : vector<16xf32> to vector<16x1xf32>
    %95 = vector.broadcast %94 : vector<16x1xf32> to vector<16x16xf32>
    %96 = arith.subf %92, %95 : vector<16x16xf32>
    %97 = math.exp %96 : vector<16x16xf32>
    %cst_39 = arith.constant dense<0.000000e+00> : vector<16xf32>
    %98 = vector.multi_reduction <add>, %97, %cst_39 [1] : vector<16x16xf32> to vector<16xf32>
    %99 = vector.shape_cast %98 : vector<16xf32> to vector<16x1xf32>
    %100 = tpu.reciprocal %99 {approx = true} : vector<16x1xf32> -> vector<16x1xf32>
    %101 = vector.broadcast %100 : vector<16x1xf32> to vector<16x16xf32>
    %102 = arith.mulf %97, %101 : vector<16x16xf32>
    %cst_40 = arith.constant dense<0.000000e+00> : vector<16x8xf32>
    %103 = tpu.matmul %102, %88, %cst_40 {dimension_numbers = #tpu.dot_dimension_numbers<[1], [0], [0], [1], [0, 0, 1, 1], [], []>} : vector<16x16xf32>, vector<16x8xf32>, vector<16x8xf32> -> vector<16x8xf32>
    %c0_41 = arith.constant 0 : index
    %c48 = arith.constant 48 : index
    %c0_42 = arith.constant 0 : index
    %104 = vector.load %arg2[%c0_41, %c48, %c0_42] : memref<2x160x96xf32, #tpu.memory_space<vmem>>, vector<1x8x32xf32>
    %105 = vector.shape_cast %104 : vector<1x8x32xf32> to vector<8x32xf32>
    %cst_43 = arith.constant dense<0.000000e+00> : vector<16x32xf32>
    %106 = tpu.matmul %103, %105, %cst_43 {dimension_numbers = #tpu.dot_dimension_numbers<[1], [0], [0], [1], [0, 0, 1, 1], [], []>} : vector<16x8xf32>, vector<8x32xf32>, vector<16x32xf32> -> vector<16x32xf32>
    %107 = arith.addf %85, %106 : vector<16x32xf32>
    %108 = vector.extract_strided_slice %40 {offsets = [0, 24], sizes = [16, 8], strides = [1, 1]} : vector<16x96xf32> to vector<16x8xf32>
    %109 = vector.extract_strided_slice %40 {offsets = [0, 56], sizes = [16, 8], strides = [1, 1]} : vector<16x96xf32> to vector<16x8xf32>
    %110 = vector.extract_strided_slice %40 {offsets = [0, 88], sizes = [16, 8], strides = [1, 1]} : vector<16x96xf32> to vector<16x8xf32>
    %cst_44 = arith.constant dense<0.000000e+00> : vector<16x16xf32>
    %111 = tpu.matmul %108, %109, %cst_44 {dimension_numbers = #tpu.dot_dimension_numbers<[1], [1], [0], [0], [0, 0, 1, 0], [], []>} : vector<16x8xf32>, vector<16x8xf32>, vector<16x16xf32> -> vector<16x16xf32>
    %cst_45 = arith.constant 0.353553385 : f32
    %112 = vector.broadcast %cst_45 : f32 to vector<16x16xf32>
    %113 = arith.mulf %111, %112 : vector<16x16xf32>
    %114 = arith.addf %113, %7 : vector<16x16xf32>
    %cst_46 = arith.constant dense<0xFF800000> : vector<16xf32>
    %115 = vector.multi_reduction <maximumf>, %114, %cst_46 [1] : vector<16x16xf32> to vector<16xf32>
    %116 = vector.shape_cast %115 : vector<16xf32> to vector<16x1xf32>
    %117 = vector.broadcast %116 : vector<16x1xf32> to vector<16x16xf32>
    %118 = arith.subf %114, %117 : vector<16x16xf32>
    %119 = math.exp %118 : vector<16x16xf32>
    %cst_47 = arith.constant dense<0.000000e+00> : vector<16xf32>
    %120 = vector.multi_reduction <add>, %119, %cst_47 [1] : vector<16x16xf32> to vector<16xf32>
    %121 = vector.shape_cast %120 : vector<16xf32> to vector<16x1xf32>
    %122 = tpu.reciprocal %121 {approx = true} : vector<16x1xf32> -> vector<16x1xf32>
    %123 = vector.broadcast %122 : vector<16x1xf32> to vector<16x16xf32>
    %124 = arith.mulf %119, %123 : vector<16x16xf32>
    %cst_48 = arith.constant dense<0.000000e+00> : vector<16x8xf32>
    %125 = tpu.matmul %124, %110, %cst_48 {dimension_numbers = #tpu.dot_dimension_numbers<[1], [0], [0], [1], [0, 0, 1, 1], [], []>} : vector<16x16xf32>, vector<16x8xf32>, vector<16x8xf32> -> vector<16x8xf32>
    %c0_49 = arith.constant 0 : index
    %c56 = arith.constant 56 : index
    %c0_50 = arith.constant 0 : index
    %126 = vector.load %arg2[%c0_49, %c56, %c0_50] : memref<2x160x96xf32, #tpu.memory_space<vmem>>, vector<1x8x32xf32>
    %127 = vector.shape_cast %126 : vector<1x8x32xf32> to vector<8x32xf32>
    %cst_51 = arith.constant dense<0.000000e+00> : vector<16x32xf32>
    %128 = tpu.matmul %125, %127, %cst_51 {dimension_numbers = #tpu.dot_dimension_numbers<[1], [0], [0], [1], [0, 0, 1, 1], [], []>} : vector<16x8xf32>, vector<8x32xf32>, vector<16x32xf32> -> vector<16x32xf32>
    %129 = arith.addf %107, %128 : vector<16x32xf32>
    %c0_52 = arith.constant 0 : index
    %c1 = arith.constant 1 : index
    %c0_53 = arith.constant 0 : index
    %130 = vector.load %arg3[%c0_52, %c1, %c0_53] : memref<2x8x128xf32, #tpu.memory_space<vmem>>, vector<1x1x32xf32>
    %131 = vector.shape_cast %130 : vector<1x1x32xf32> to vector<1x32xf32>
    %132 = arith.addf %1, %129 : vector<16x32xf32>
    %133 = vector.broadcast %131 : vector<1x32xf32> to vector<16x32xf32>
    %134 = arith.addf %132, %133 : vector<16x32xf32>
    %c0_54 = arith.constant 0 : index
    %c4 = arith.constant 4 : index
    %c0_55 = arith.constant 0 : index
    %135 = vector.load %arg3[%c0_54, %c4, %c0_55] : memref<2x8x128xf32, #tpu.memory_space<vmem>>, vector<1x1x32xf32>
    %136 = vector.shape_cast %135 : vector<1x1x32xf32> to vector<1x32xf32>
    %c0_56 = arith.constant 0 : index
    %c5 = arith.constant 5 : index
    %c0_57 = arith.constant 0 : index
    %137 = vector.load %arg3[%c0_56, %c5, %c0_57] : memref<2x8x128xf32, #tpu.memory_space<vmem>>, vector<1x1x32xf32>
    %138 = vector.shape_cast %137 : vector<1x1x32xf32> to vector<1x32xf32>
    %cst_58 = arith.constant dense<0.000000e+00> : vector<16xf32>
    %139 = vector.multi_reduction <add>, %134, %cst_58 [1] : vector<16x32xf32> to vector<16xf32>
    %140 = vector.shape_cast %139 : vector<16xf32> to vector<16x1xf32>
    %cst_59 = arith.constant 3.200000e+01 : f32
    %141 = vector.broadcast %cst_59 : f32 to vector<16x1xf32>
    %142 = arith.divf %140, %141 : vector<16x1xf32>
    %143 = vector.broadcast %142 : vector<16x1xf32> to vector<16x32xf32>
    %144 = arith.subf %134, %143 : vector<16x32xf32>
    %145 = arith.mulf %144, %144 : vector<16x32xf32>
    %cst_60 = arith.constant dense<0.000000e+00> : vector<16xf32>
    %146 = vector.multi_reduction <add>, %145, %cst_60 [1] : vector<16x32xf32> to vector<16xf32>
    %147 = vector.shape_cast %146 : vector<16xf32> to vector<16x1xf32>
    %cst_61 = arith.constant 3.200000e+01 : f32
    %148 = vector.broadcast %cst_61 : f32 to vector<16x1xf32>
    %149 = arith.divf %147, %148 : vector<16x1xf32>
    %150 = vector.broadcast %142 : vector<16x1xf32> to vector<16x32xf32>
    %151 = arith.subf %134, %150 : vector<16x32xf32>
    %cst_62 = arith.constant 9.99999974E-6 : f32
    %152 = vector.broadcast %cst_62 : f32 to vector<16x1xf32>
    %153 = arith.addf %149, %152 : vector<16x1xf32>
    %154 = math.rsqrt %153 : vector<16x1xf32>
    %155 = vector.broadcast %154 : vector<16x1xf32> to vector<16x32xf32>
    %156 = arith.mulf %151, %155 : vector<16x32xf32>
    %157 = vector.broadcast %136 : vector<1x32xf32> to vector<16x32xf32>
    %158 = arith.mulf %156, %157 : vector<16x32xf32>
    %159 = vector.broadcast %138 : vector<1x32xf32> to vector<16x32xf32>
    %160 = arith.addf %158, %159 : vector<16x32xf32>
    %c0_63 = arith.constant 0 : index
    %c64 = arith.constant 64 : index
    %c0_64 = arith.constant 0 : index
    %161 = vector.load %arg2[%c0_63, %c64, %c0_64] : memref<2x160x96xf32, #tpu.memory_space<vmem>>, vector<1x32x64xf32>
    %162 = vector.shape_cast %161 : vector<1x32x64xf32> to vector<32x64xf32>
    %c0_65 = arith.constant 0 : index
    %c6 = arith.constant 6 : index
    %c0_66 = arith.constant 0 : index
    %163 = vector.load %arg3[%c0_65, %c6, %c0_66] : memref<2x8x128xf32, #tpu.memory_space<vmem>>, vector<1x1x64xf32>
    %164 = vector.shape_cast %163 : vector<1x1x64xf32> to vector<1x64xf32>
    %cst_67 = arith.constant dense<0.000000e+00> : vector<16x64xf32>
    %165 = tpu.matmul %160, %162, %cst_67 {dimension_numbers = #tpu.dot_dimension_numbers<[1], [0], [0], [1], [0, 0, 1, 1], [], []>} : vector<16x32xf32>, vector<32x64xf32>, vector<16x64xf32> -> vector<16x64xf32>
    %166 = vector.broadcast %164 : vector<1x64xf32> to vector<16x64xf32>
    %167 = arith.addf %165, %166 : vector<16x64xf32>
    %cst_68 = arith.constant 0.000000e+00 : f32
    %168 = vector.broadcast %cst_68 : f32 to vector<16x64xf32>
    %169 = arith.maximumf %167, %168 : vector<16x64xf32>
    %c0_69 = arith.constant 0 : index
    %c96 = arith.constant 96 : index
    %c0_70 = arith.constant 0 : index
    %170 = vector.load %arg2[%c0_69, %c96, %c0_70] : memref<2x160x96xf32, #tpu.memory_space<vmem>>, vector<1x64x32xf32>
    %171 = vector.shape_cast %170 : vector<1x64x32xf32> to vector<64x32xf32>
    %c0_71 = arith.constant 0 : index
    %c7 = arith.constant 7 : index
    %c0_72 = arith.constant 0 : index
    %172 = vector.load %arg3[%c0_71, %c7, %c0_72] : memref<2x8x128xf32, #tpu.memory_space<vmem>>, vector<1x1x32xf32>
    %173 = vector.shape_cast %172 : vector<1x1x32xf32> to vector<1x32xf32>
    %cst_73 = arith.constant dense<0.000000e+00> : vector<16x32xf32>
    %174 = tpu.matmul %169, %171, %cst_73 {dimension_numbers = #tpu.dot_dimension_numbers<[1], [0], [0], [1], [0, 0, 1, 1], [], []>} : vector<16x64xf32>, vector<64x32xf32>, vector<16x32xf32> -> vector<16x32xf32>
    %175 = arith.addf %134, %174 : vector<16x32xf32>
    %176 = vector.broadcast %173 : vector<1x32xf32> to vector<16x32xf32>
    %177 = arith.addf %175, %176 : vector<16x32xf32>
    %c1_74 = arith.constant 1 : index
    %c2_75 = arith.constant 2 : index
    %c0_76 = arith.constant 0 : index
    %178 = vector.load %arg3[%c1_74, %c2_75, %c0_76] : memref<2x8x128xf32, #tpu.memory_space<vmem>>, vector<1x1x32xf32>
    %179 = vector.shape_cast %178 : vector<1x1x32xf32> to vector<1x32xf32>
    %c1_77 = arith.constant 1 : index
    %c3_78 = arith.constant 3 : index
    %c0_79 = arith.constant 0 : index
    %180 = vector.load %arg3[%c1_77, %c3_78, %c0_79] : memref<2x8x128xf32, #tpu.memory_space<vmem>>, vector<1x1x32xf32>
    %181 = vector.shape_cast %180 : vector<1x1x32xf32> to vector<1x32xf32>
    %cst_80 = arith.constant dense<0.000000e+00> : vector<16xf32>
    %182 = vector.multi_reduction <add>, %177, %cst_80 [1] : vector<16x32xf32> to vector<16xf32>
    %183 = vector.shape_cast %182 : vector<16xf32> to vector<16x1xf32>
    %cst_81 = arith.constant 3.200000e+01 : f32
    %184 = vector.broadcast %cst_81 : f32 to vector<16x1xf32>
    %185 = arith.divf %183, %184 : vector<16x1xf32>
    %186 = vector.broadcast %185 : vector<16x1xf32> to vector<16x32xf32>
    %187 = arith.subf %177, %186 : vector<16x32xf32>
    %188 = arith.mulf %187, %187 : vector<16x32xf32>
    %cst_82 = arith.constant dense<0.000000e+00> : vector<16xf32>
    %189 = vector.multi_reduction <add>, %188, %cst_82 [1] : vector<16x32xf32> to vector<16xf32>
    %190 = vector.shape_cast %189 : vector<16xf32> to vector<16x1xf32>
    %cst_83 = arith.constant 3.200000e+01 : f32
    %191 = vector.broadcast %cst_83 : f32 to vector<16x1xf32>
    %192 = arith.divf %190, %191 : vector<16x1xf32>
    %193 = vector.broadcast %185 : vector<16x1xf32> to vector<16x32xf32>
    %194 = arith.subf %177, %193 : vector<16x32xf32>
    %cst_84 = arith.constant 9.99999974E-6 : f32
    %195 = vector.broadcast %cst_84 : f32 to vector<16x1xf32>
    %196 = arith.addf %192, %195 : vector<16x1xf32>
    %197 = math.rsqrt %196 : vector<16x1xf32>
    %198 = vector.broadcast %197 : vector<16x1xf32> to vector<16x32xf32>
    %199 = arith.mulf %194, %198 : vector<16x32xf32>
    %200 = vector.broadcast %179 : vector<1x32xf32> to vector<16x32xf32>
    %201 = arith.mulf %199, %200 : vector<16x32xf32>
    %202 = vector.broadcast %181 : vector<1x32xf32> to vector<16x32xf32>
    %203 = arith.addf %201, %202 : vector<16x32xf32>
    %c1_85 = arith.constant 1 : index
    %c0_86 = arith.constant 0 : index
    %c0_87 = arith.constant 0 : index
    %204 = vector.load %arg2[%c1_85, %c0_86, %c0_87] : memref<2x160x96xf32, #tpu.memory_space<vmem>>, vector<1x32x96xf32>
    %205 = vector.shape_cast %204 : vector<1x32x96xf32> to vector<32x96xf32>
    %c1_88 = arith.constant 1 : index
    %c0_89 = arith.constant 0 : index
    %c0_90 = arith.constant 0 : index
    %206 = vector.load %arg3[%c1_88, %c0_89, %c0_90] : memref<2x8x128xf32, #tpu.memory_space<vmem>>, vector<1x1x96xf32>
    %207 = vector.shape_cast %206 : vector<1x1x96xf32> to vector<1x96xf32>
    %cst_91 = arith.constant dense<0.000000e+00> : vector<16x96xf32>
    %208 = tpu.matmul %203, %205, %cst_91 {dimension_numbers = #tpu.dot_dimension_numbers<[1], [0], [0], [1], [0, 0, 1, 1], [], []>} : vector<16x32xf32>, vector<32x96xf32>, vector<16x96xf32> -> vector<16x96xf32>
    %209 = vector.broadcast %207 : vector<1x96xf32> to vector<16x96xf32>
    %210 = arith.addf %208, %209 : vector<16x96xf32>
    %cst_92 = arith.constant 0.000000e+00 : f32
    %211 = vector.broadcast %cst_92 : f32 to vector<16x32xf32>
    %212 = vector.extract_strided_slice %210 {offsets = [0, 0], sizes = [16, 8], strides = [1, 1]} : vector<16x96xf32> to vector<16x8xf32>
    %213 = vector.extract_strided_slice %210 {offsets = [0, 32], sizes = [16, 8], strides = [1, 1]} : vector<16x96xf32> to vector<16x8xf32>
    %214 = vector.extract_strided_slice %210 {offsets = [0, 64], sizes = [16, 8], strides = [1, 1]} : vector<16x96xf32> to vector<16x8xf32>
    %cst_93 = arith.constant dense<0.000000e+00> : vector<16x16xf32>
    %215 = tpu.matmul %212, %213, %cst_93 {dimension_numbers = #tpu.dot_dimension_numbers<[1], [1], [0], [0], [0, 0, 1, 0], [], []>} : vector<16x8xf32>, vector<16x8xf32>, vector<16x16xf32> -> vector<16x16xf32>
    %cst_94 = arith.constant 0.353553385 : f32
    %216 = vector.broadcast %cst_94 : f32 to vector<16x16xf32>
    %217 = arith.mulf %215, %216 : vector<16x16xf32>
    %218 = arith.addf %217, %7 : vector<16x16xf32>
    %cst_95 = arith.constant dense<0xFF800000> : vector<16xf32>
    %219 = vector.multi_reduction <maximumf>, %218, %cst_95 [1] : vector<16x16xf32> to vector<16xf32>
    %220 = vector.shape_cast %219 : vector<16xf32> to vector<16x1xf32>
    %221 = vector.broadcast %220 : vector<16x1xf32> to vector<16x16xf32>
    %222 = arith.subf %218, %221 : vector<16x16xf32>
    %223 = math.exp %222 : vector<16x16xf32>
    %cst_96 = arith.constant dense<0.000000e+00> : vector<16xf32>
    %224 = vector.multi_reduction <add>, %223, %cst_96 [1] : vector<16x16xf32> to vector<16xf32>
    %225 = vector.shape_cast %224 : vector<16xf32> to vector<16x1xf32>
    %226 = tpu.reciprocal %225 {approx = true} : vector<16x1xf32> -> vector<16x1xf32>
    %227 = vector.broadcast %226 : vector<16x1xf32> to vector<16x16xf32>
    %228 = arith.mulf %223, %227 : vector<16x16xf32>
    %cst_97 = arith.constant dense<0.000000e+00> : vector<16x8xf32>
    %229 = tpu.matmul %228, %214, %cst_97 {dimension_numbers = #tpu.dot_dimension_numbers<[1], [0], [0], [1], [0, 0, 1, 1], [], []>} : vector<16x16xf32>, vector<16x8xf32>, vector<16x8xf32> -> vector<16x8xf32>
    %c1_98 = arith.constant 1 : index
    %c32_99 = arith.constant 32 : index
    %c0_100 = arith.constant 0 : index
    %230 = vector.load %arg2[%c1_98, %c32_99, %c0_100] : memref<2x160x96xf32, #tpu.memory_space<vmem>>, vector<1x8x32xf32>
    %231 = vector.shape_cast %230 : vector<1x8x32xf32> to vector<8x32xf32>
    %cst_101 = arith.constant dense<0.000000e+00> : vector<16x32xf32>
    %232 = tpu.matmul %229, %231, %cst_101 {dimension_numbers = #tpu.dot_dimension_numbers<[1], [0], [0], [1], [0, 0, 1, 1], [], []>} : vector<16x8xf32>, vector<8x32xf32>, vector<16x32xf32> -> vector<16x32xf32>
    %233 = arith.addf %211, %232 : vector<16x32xf32>
    %234 = vector.extract_strided_slice %210 {offsets = [0, 8], sizes = [16, 8], strides = [1, 1]} : vector<16x96xf32> to vector<16x8xf32>
    %235 = vector.extract_strided_slice %210 {offsets = [0, 40], sizes = [16, 8], strides = [1, 1]} : vector<16x96xf32> to vector<16x8xf32>
    %236 = vector.extract_strided_slice %210 {offsets = [0, 72], sizes = [16, 8], strides = [1, 1]} : vector<16x96xf32> to vector<16x8xf32>
    %cst_102 = arith.constant dense<0.000000e+00> : vector<16x16xf32>
    %237 = tpu.matmul %234, %235, %cst_102 {dimension_numbers = #tpu.dot_dimension_numbers<[1], [1], [0], [0], [0, 0, 1, 0], [], []>} : vector<16x8xf32>, vector<16x8xf32>, vector<16x16xf32> -> vector<16x16xf32>
    %cst_103 = arith.constant 0.353553385 : f32
    %238 = vector.broadcast %cst_103 : f32 to vector<16x16xf32>
    %239 = arith.mulf %237, %238 : vector<16x16xf32>
    %240 = arith.addf %239, %7 : vector<16x16xf32>
    %cst_104 = arith.constant dense<0xFF800000> : vector<16xf32>
    %241 = vector.multi_reduction <maximumf>, %240, %cst_104 [1] : vector<16x16xf32> to vector<16xf32>
    %242 = vector.shape_cast %241 : vector<16xf32> to vector<16x1xf32>
    %243 = vector.broadcast %242 : vector<16x1xf32> to vector<16x16xf32>
    %244 = arith.subf %240, %243 : vector<16x16xf32>
    %245 = math.exp %244 : vector<16x16xf32>
    %cst_105 = arith.constant dense<0.000000e+00> : vector<16xf32>
    %246 = vector.multi_reduction <add>, %245, %cst_105 [1] : vector<16x16xf32> to vector<16xf32>
    %247 = vector.shape_cast %246 : vector<16xf32> to vector<16x1xf32>
    %248 = tpu.reciprocal %247 {approx = true} : vector<16x1xf32> -> vector<16x1xf32>
    %249 = vector.broadcast %248 : vector<16x1xf32> to vector<16x16xf32>
    %250 = arith.mulf %245, %249 : vector<16x16xf32>
    %cst_106 = arith.constant dense<0.000000e+00> : vector<16x8xf32>
    %251 = tpu.matmul %250, %236, %cst_106 {dimension_numbers = #tpu.dot_dimension_numbers<[1], [0], [0], [1], [0, 0, 1, 1], [], []>} : vector<16x16xf32>, vector<16x8xf32>, vector<16x8xf32> -> vector<16x8xf32>
    %c1_107 = arith.constant 1 : index
    %c40_108 = arith.constant 40 : index
    %c0_109 = arith.constant 0 : index
    %252 = vector.load %arg2[%c1_107, %c40_108, %c0_109] : memref<2x160x96xf32, #tpu.memory_space<vmem>>, vector<1x8x32xf32>
    %253 = vector.shape_cast %252 : vector<1x8x32xf32> to vector<8x32xf32>
    %cst_110 = arith.constant dense<0.000000e+00> : vector<16x32xf32>
    %254 = tpu.matmul %251, %253, %cst_110 {dimension_numbers = #tpu.dot_dimension_numbers<[1], [0], [0], [1], [0, 0, 1, 1], [], []>} : vector<16x8xf32>, vector<8x32xf32>, vector<16x32xf32> -> vector<16x32xf32>
    %255 = arith.addf %233, %254 : vector<16x32xf32>
    %256 = vector.extract_strided_slice %210 {offsets = [0, 16], sizes = [16, 8], strides = [1, 1]} : vector<16x96xf32> to vector<16x8xf32>
    %257 = vector.extract_strided_slice %210 {offsets = [0, 48], sizes = [16, 8], strides = [1, 1]} : vector<16x96xf32> to vector<16x8xf32>
    %258 = vector.extract_strided_slice %210 {offsets = [0, 80], sizes = [16, 8], strides = [1, 1]} : vector<16x96xf32> to vector<16x8xf32>
    %cst_111 = arith.constant dense<0.000000e+00> : vector<16x16xf32>
    %259 = tpu.matmul %256, %257, %cst_111 {dimension_numbers = #tpu.dot_dimension_numbers<[1], [1], [0], [0], [0, 0, 1, 0], [], []>} : vector<16x8xf32>, vector<16x8xf32>, vector<16x16xf32> -> vector<16x16xf32>
    %cst_112 = arith.constant 0.353553385 : f32
    %260 = vector.broadcast %cst_112 : f32 to vector<16x16xf32>
    %261 = arith.mulf %259, %260 : vector<16x16xf32>
    %262 = arith.addf %261, %7 : vector<16x16xf32>
    %cst_113 = arith.constant dense<0xFF800000> : vector<16xf32>
    %263 = vector.multi_reduction <maximumf>, %262, %cst_113 [1] : vector<16x16xf32> to vector<16xf32>
    %264 = vector.shape_cast %263 : vector<16xf32> to vector<16x1xf32>
    %265 = vector.broadcast %264 : vector<16x1xf32> to vector<16x16xf32>
    %266 = arith.subf %262, %265 : vector<16x16xf32>
    %267 = math.exp %266 : vector<16x16xf32>
    %cst_114 = arith.constant dense<0.000000e+00> : vector<16xf32>
    %268 = vector.multi_reduction <add>, %267, %cst_114 [1] : vector<16x16xf32> to vector<16xf32>
    %269 = vector.shape_cast %268 : vector<16xf32> to vector<16x1xf32>
    %270 = tpu.reciprocal %269 {approx = true} : vector<16x1xf32> -> vector<16x1xf32>
    %271 = vector.broadcast %270 : vector<16x1xf32> to vector<16x16xf32>
    %272 = arith.mulf %267, %271 : vector<16x16xf32>
    %cst_115 = arith.constant dense<0.000000e+00> : vector<16x8xf32>
    %273 = tpu.matmul %272, %258, %cst_115 {dimension_numbers = #tpu.dot_dimension_numbers<[1], [0], [0], [1], [0, 0, 1, 1], [], []>} : vector<16x16xf32>, vector<16x8xf32>, vector<16x8xf32> -> vector<16x8xf32>
    %c1_116 = arith.constant 1 : index
    %c48_117 = arith.constant 48 : index
    %c0_118 = arith.constant 0 : index
    %274 = vector.load %arg2[%c1_116, %c48_117, %c0_118] : memref<2x160x96xf32, #tpu.memory_space<vmem>>, vector<1x8x32xf32>
    %275 = vector.shape_cast %274 : vector<1x8x32xf32> to vector<8x32xf32>
    %cst_119 = arith.constant dense<0.000000e+00> : vector<16x32xf32>
    %276 = tpu.matmul %273, %275, %cst_119 {dimension_numbers = #tpu.dot_dimension_numbers<[1], [0], [0], [1], [0, 0, 1, 1], [], []>} : vector<16x8xf32>, vector<8x32xf32>, vector<16x32xf32> -> vector<16x32xf32>
    %277 = arith.addf %255, %276 : vector<16x32xf32>
    %278 = vector.extract_strided_slice %210 {offsets = [0, 24], sizes = [16, 8], strides = [1, 1]} : vector<16x96xf32> to vector<16x8xf32>
    %279 = vector.extract_strided_slice %210 {offsets = [0, 56], sizes = [16, 8], strides = [1, 1]} : vector<16x96xf32> to vector<16x8xf32>
    %280 = vector.extract_strided_slice %210 {offsets = [0, 88], sizes = [16, 8], strides = [1, 1]} : vector<16x96xf32> to vector<16x8xf32>
    %cst_120 = arith.constant dense<0.000000e+00> : vector<16x16xf32>
    %281 = tpu.matmul %278, %279, %cst_120 {dimension_numbers = #tpu.dot_dimension_numbers<[1], [1], [0], [0], [0, 0, 1, 0], [], []>} : vector<16x8xf32>, vector<16x8xf32>, vector<16x16xf32> -> vector<16x16xf32>
    %cst_121 = arith.constant 0.353553385 : f32
    %282 = vector.broadcast %cst_121 : f32 to vector<16x16xf32>
    %283 = arith.mulf %281, %282 : vector<16x16xf32>
    %284 = arith.addf %283, %7 : vector<16x16xf32>
    %cst_122 = arith.constant dense<0xFF800000> : vector<16xf32>
    %285 = vector.multi_reduction <maximumf>, %284, %cst_122 [1] : vector<16x16xf32> to vector<16xf32>
    %286 = vector.shape_cast %285 : vector<16xf32> to vector<16x1xf32>
    %287 = vector.broadcast %286 : vector<16x1xf32> to vector<16x16xf32>
    %288 = arith.subf %284, %287 : vector<16x16xf32>
    %289 = math.exp %288 : vector<16x16xf32>
    %cst_123 = arith.constant dense<0.000000e+00> : vector<16xf32>
    %290 = vector.multi_reduction <add>, %289, %cst_123 [1] : vector<16x16xf32> to vector<16xf32>
    %291 = vector.shape_cast %290 : vector<16xf32> to vector<16x1xf32>
    %292 = tpu.reciprocal %291 {approx = true} : vector<16x1xf32> -> vector<16x1xf32>
    %293 = vector.broadcast %292 : vector<16x1xf32> to vector<16x16xf32>
    %294 = arith.mulf %289, %293 : vector<16x16xf32>
    %cst_124 = arith.constant dense<0.000000e+00> : vector<16x8xf32>
    %295 = tpu.matmul %294, %280, %cst_124 {dimension_numbers = #tpu.dot_dimension_numbers<[1], [0], [0], [1], [0, 0, 1, 1], [], []>} : vector<16x16xf32>, vector<16x8xf32>, vector<16x8xf32> -> vector<16x8xf32>
    %c1_125 = arith.constant 1 : index
    %c56_126 = arith.constant 56 : index
    %c0_127 = arith.constant 0 : index
    %296 = vector.load %arg2[%c1_125, %c56_126, %c0_127] : memref<2x160x96xf32, #tpu.memory_space<vmem>>, vector<1x8x32xf32>
    %297 = vector.shape_cast %296 : vector<1x8x32xf32> to vector<8x32xf32>
    %cst_128 = arith.constant dense<0.000000e+00> : vector<16x32xf32>
    %298 = tpu.matmul %295, %297, %cst_128 {dimension_numbers = #tpu.dot_dimension_numbers<[1], [0], [0], [1], [0, 0, 1, 1], [], []>} : vector<16x8xf32>, vector<8x32xf32>, vector<16x32xf32> -> vector<16x32xf32>
    %299 = arith.addf %277, %298 : vector<16x32xf32>
    %c1_129 = arith.constant 1 : index
    %c1_130 = arith.constant 1 : index
    %c0_131 = arith.constant 0 : index
    %300 = vector.load %arg3[%c1_129, %c1_130, %c0_131] : memref<2x8x128xf32, #tpu.memory_space<vmem>>, vector<1x1x32xf32>
    %301 = vector.shape_cast %300 : vector<1x1x32xf32> to vector<1x32xf32>
    %302 = arith.addf %177, %299 : vector<16x32xf32>
    %303 = vector.broadcast %301 : vector<1x32xf32> to vector<16x32xf32>
    %304 = arith.addf %302, %303 : vector<16x32xf32>
    %c1_132 = arith.constant 1 : index
    %c4_133 = arith.constant 4 : index
    %c0_134 = arith.constant 0 : index
    %305 = vector.load %arg3[%c1_132, %c4_133, %c0_134] : memref<2x8x128xf32, #tpu.memory_space<vmem>>, vector<1x1x32xf32>
    %306 = vector.shape_cast %305 : vector<1x1x32xf32> to vector<1x32xf32>
    %c1_135 = arith.constant 1 : index
    %c5_136 = arith.constant 5 : index
    %c0_137 = arith.constant 0 : index
    %307 = vector.load %arg3[%c1_135, %c5_136, %c0_137] : memref<2x8x128xf32, #tpu.memory_space<vmem>>, vector<1x1x32xf32>
    %308 = vector.shape_cast %307 : vector<1x1x32xf32> to vector<1x32xf32>
    %cst_138 = arith.constant dense<0.000000e+00> : vector<16xf32>
    %309 = vector.multi_reduction <add>, %304, %cst_138 [1] : vector<16x32xf32> to vector<16xf32>
    %310 = vector.shape_cast %309 : vector<16xf32> to vector<16x1xf32>
    %cst_139 = arith.constant 3.200000e+01 : f32
    %311 = vector.broadcast %cst_139 : f32 to vector<16x1xf32>
    %312 = arith.divf %310, %311 : vector<16x1xf32>
    %313 = vector.broadcast %312 : vector<16x1xf32> to vector<16x32xf32>
    %314 = arith.subf %304, %313 : vector<16x32xf32>
    %315 = arith.mulf %314, %314 : vector<16x32xf32>
    %cst_140 = arith.constant dense<0.000000e+00> : vector<16xf32>
    %316 = vector.multi_reduction <add>, %315, %cst_140 [1] : vector<16x32xf32> to vector<16xf32>
    %317 = vector.shape_cast %316 : vector<16xf32> to vector<16x1xf32>
    %cst_141 = arith.constant 3.200000e+01 : f32
    %318 = vector.broadcast %cst_141 : f32 to vector<16x1xf32>
    %319 = arith.divf %317, %318 : vector<16x1xf32>
    %320 = vector.broadcast %312 : vector<16x1xf32> to vector<16x32xf32>
    %321 = arith.subf %304, %320 : vector<16x32xf32>
    %cst_142 = arith.constant 9.99999974E-6 : f32
    %322 = vector.broadcast %cst_142 : f32 to vector<16x1xf32>
    %323 = arith.addf %319, %322 : vector<16x1xf32>
    %324 = math.rsqrt %323 : vector<16x1xf32>
    %325 = vector.broadcast %324 : vector<16x1xf32> to vector<16x32xf32>
    %326 = arith.mulf %321, %325 : vector<16x32xf32>
    %327 = vector.broadcast %306 : vector<1x32xf32> to vector<16x32xf32>
    %328 = arith.mulf %326, %327 : vector<16x32xf32>
    %329 = vector.broadcast %308 : vector<1x32xf32> to vector<16x32xf32>
    %330 = arith.addf %328, %329 : vector<16x32xf32>
    %c1_143 = arith.constant 1 : index
    %c64_144 = arith.constant 64 : index
    %c0_145 = arith.constant 0 : index
    %331 = vector.load %arg2[%c1_143, %c64_144, %c0_145] : memref<2x160x96xf32, #tpu.memory_space<vmem>>, vector<1x32x64xf32>
    %332 = vector.shape_cast %331 : vector<1x32x64xf32> to vector<32x64xf32>
    %c1_146 = arith.constant 1 : index
    %c6_147 = arith.constant 6 : index
    %c0_148 = arith.constant 0 : index
    %333 = vector.load %arg3[%c1_146, %c6_147, %c0_148] : memref<2x8x128xf32, #tpu.memory_space<vmem>>, vector<1x1x64xf32>
    %334 = vector.shape_cast %333 : vector<1x1x64xf32> to vector<1x64xf32>
    %cst_149 = arith.constant dense<0.000000e+00> : vector<16x64xf32>
    %335 = tpu.matmul %330, %332, %cst_149 {dimension_numbers = #tpu.dot_dimension_numbers<[1], [0], [0], [1], [0, 0, 1, 1], [], []>} : vector<16x32xf32>, vector<32x64xf32>, vector<16x64xf32> -> vector<16x64xf32>
    %336 = vector.broadcast %334 : vector<1x64xf32> to vector<16x64xf32>
    %337 = arith.addf %335, %336 : vector<16x64xf32>
    %cst_150 = arith.constant 0.000000e+00 : f32
    %338 = vector.broadcast %cst_150 : f32 to vector<16x64xf32>
    %339 = arith.maximumf %337, %338 : vector<16x64xf32>
    %c1_151 = arith.constant 1 : index
    %c96_152 = arith.constant 96 : index
    %c0_153 = arith.constant 0 : index
    %340 = vector.load %arg2[%c1_151, %c96_152, %c0_153] : memref<2x160x96xf32, #tpu.memory_space<vmem>>, vector<1x64x32xf32>
    %341 = vector.shape_cast %340 : vector<1x64x32xf32> to vector<64x32xf32>
    %c1_154 = arith.constant 1 : index
    %c7_155 = arith.constant 7 : index
    %c0_156 = arith.constant 0 : index
    %342 = vector.load %arg3[%c1_154, %c7_155, %c0_156] : memref<2x8x128xf32, #tpu.memory_space<vmem>>, vector<1x1x32xf32>
    %343 = vector.shape_cast %342 : vector<1x1x32xf32> to vector<1x32xf32>
    %cst_157 = arith.constant dense<0.000000e+00> : vector<16x32xf32>
    %344 = tpu.matmul %339, %341, %cst_157 {dimension_numbers = #tpu.dot_dimension_numbers<[1], [0], [0], [1], [0, 0, 1, 1], [], []>} : vector<16x64xf32>, vector<64x32xf32>, vector<16x32xf32> -> vector<16x32xf32>
    %345 = arith.addf %304, %344 : vector<16x32xf32>
    %346 = vector.broadcast %343 : vector<1x32xf32> to vector<16x32xf32>
    %347 = arith.addf %345, %346 : vector<16x32xf32>
    %348 = vector.extract_strided_slice %347 {offsets = [0, 0], sizes = [8, 32], strides = [1, 1]} : vector<16x32xf32> to vector<8x32xf32>
    %c0_158 = arith.constant 0 : index
    %c0_159 = arith.constant 0 : index
    %349 = vector.load %arg4[%c0_158, %c0_159] : memref<112x128xf32, #tpu.memory_space<vmem>>, vector<32x64xf32>
    %c96_160 = arith.constant 96 : index
    %c0_161 = arith.constant 0 : index
    %350 = vector.load %arg4[%c96_160, %c0_161] : memref<112x128xf32, #tpu.memory_space<vmem>>, vector<1x64xf32>
    %cst_162 = arith.constant dense<0.000000e+00> : vector<8x64xf32>
    %351 = tpu.matmul %348, %349, %cst_162 {dimension_numbers = #tpu.dot_dimension_numbers<[1], [0], [0], [1], [0, 0, 1, 1], [], []>} : vector<8x32xf32>, vector<32x64xf32>, vector<8x64xf32> -> vector<8x64xf32>
    %352 = vector.broadcast %350 : vector<1x64xf32> to vector<8x64xf32>
    %353 = arith.addf %351, %352 : vector<8x64xf32>
    %cst_163 = arith.constant 5.000000e-01 : f32
    %354 = vector.broadcast %cst_163 : f32 to vector<8x64xf32>
    %355 = arith.mulf %354, %353 : vector<8x64xf32>
    %cst_164 = arith.constant 1.41421354 : f32
    %356 = vector.broadcast %cst_164 : f32 to vector<8x64xf32>
    %357 = arith.divf %353, %356 : vector<8x64xf32>
    %358 = math.erf %357 : vector<8x64xf32>
    %cst_165 = arith.constant 1.000000e+00 : f32
    %359 = vector.broadcast %cst_165 : f32 to vector<8x64xf32>
    %360 = arith.addf %359, %358 : vector<8x64xf32>
    %361 = arith.mulf %355, %360 : vector<8x64xf32>
    %c32_166 = arith.constant 32 : index
    %c0_167 = arith.constant 0 : index
    %362 = vector.load %arg4[%c32_166, %c0_167] : memref<112x128xf32, #tpu.memory_space<vmem>>, vector<64x128xf32>
    %c104 = arith.constant 104 : index
    %c0_168 = arith.constant 0 : index
    %363 = vector.load %arg4[%c104, %c0_168] : memref<112x128xf32, #tpu.memory_space<vmem>>, vector<1x128xf32>
    %cst_169 = arith.constant dense<0.000000e+00> : vector<8x128xf32>
    %364 = tpu.matmul %361, %362, %cst_169 {dimension_numbers = #tpu.dot_dimension_numbers<[1], [0], [0], [1], [0, 0, 1, 1], [], []>} : vector<8x64xf32>, vector<64x128xf32>, vector<8x128xf32> -> vector<8x128xf32>
    %365 = vector.broadcast %363 : vector<1x128xf32> to vector<8x128xf32>
    %366 = arith.addf %364, %365 : vector<8x128xf32>
    %c0_170 = arith.constant 0 : index
    %c0_171 = arith.constant 0 : index
    %c0_172 = arith.constant 0 : index
    %367 = vector.load %arg5[%c0_170, %c0_171, %c0_172] : memref<1x8x128xf32, #tpu.memory_space<vmem>>, vector<1x8x128xf32>
    %368 = vector.shape_cast %367 : vector<1x8x128xf32> to vector<8x128xf32>
    %369 = vector.shape_cast %366 : vector<8x128xf32> to vector<1x8x128xf32>
    tpu.vector_store %arg5[%c0_170, %c0_171, %c0_172], %369 {strides = array<i32>} : memref<1x8x128xf32, #tpu.memory_space<vmem>>, vector<1x8x128xf32>,
    return
  }
  func.func @transform_0(%arg0: i32) -> (i32, i32, i32) {
    %c0_i32 = arith.constant 0 : i32
    %c0_i32_0 = arith.constant 0 : i32
    %c0_i32_1 = arith.constant 0 : i32
    return %arg0, %c0_i32, %c0_i32_0 : i32, i32, i32
  }
  func.func @transform_1(%arg0: i32) -> (i32, i32, i32) {
    %c0_i32 = arith.constant 0 : i32
    %c0_i32_0 = arith.constant 0 : i32
    %c0_i32_1 = arith.constant 0 : i32
    %c0_i32_2 = arith.constant 0 : i32
    return %c0_i32, %c0_i32_0, %c0_i32_1 : i32, i32, i32
  }
  func.func @transform_2(%arg0: i32) -> (i32, i32, i32) {
    %c0_i32 = arith.constant 0 : i32
    %c0_i32_0 = arith.constant 0 : i32
    %c0_i32_1 = arith.constant 0 : i32
    %c0_i32_2 = arith.constant 0 : i32
    return %c0_i32, %c0_i32_0, %c0_i32_1 : i32, i32, i32
  }
  func.func @transform_3(%arg0: i32) -> (i32, i32) {
    %c0_i32 = arith.constant 0 : i32
    %c0_i32_0 = arith.constant 0 : i32
    %c0_i32_1 = arith.constant 0 : i32
    return %c0_i32, %c0_i32_0 : i32, i32
  }
  func.func @transform_4(%arg0: i32) -> (i32, i32, i32) {
    %c0_i32 = arith.constant 0 : i32
    %c0_i32_0 = arith.constant 0 : i32
    %c0_i32_1 = arith.constant 0 : i32
    return %arg0, %c0_i32, %c0_i32_0 : i32, i32, i32
  }
}

</mosaic_0001>

<bundles_post_ra>
// kernel: font_classifier_forward.1
= control target key start
LH: loop header
LB: loop body
LE: loop exit
PB: predicated region body
PF: predicated region fallthrough
CT: control target
= control target key end

     0   :  { %s4416_s15 = smov 0   ;;  %s4924_s0 = inlined_call_operand.vmem [shape: f32[2,16,32], index: 0, kind: input, shape index: {}]   ;;  %s4925_s1 = inlined_call_operand.vmem [shape: f32[2,160,96], index: 1, kind: input, shape index: {}]   ;;  %s4926_s2 = inlined_call_operand.vmem [shape: f32[2,8,128], index: 2, kind: input, shape index: {}]   ;;  %s4927_s3 = inlined_call_operand.vmem [shape: f32[112,128], index: 3, kind: input, shape index: {}]   ;;  %s4928_s4 = inlined_call_operand.vmem [shape: f32[2,8,128], index: 4, kind: output, shape index: {}]  }
   0x1 LB: > { %s3464_s16 = sadd.s32 4294967295, %s4374_s15   ;;  %p3468_p0 = scmp.ge.s32.totalorder %s4374_s15, 1  ;;  %s4374_s15 = sphi %s4416_s15, %s14_s15  }
   0x2   : > { %p162_p1 = scmp.lt.s32.totalorder %s4374_s15, 3 }
   0x4   : > { %p163_p2 = pnand %p3468_p0, %p162_p1 }
   0x5   : > { %p187_p3 = scmp.lt.s32.totalorder (!%p163_p2), %s3464_s16, 1  ;;  %vm204_vm0 = vcmask (!%p163_p2), 261120   ;;  %v244_v14 = vld [vmem:[%s4925_s1] sm:$0xff] (!%p163_p2)  ;;  %v245_v15 = vld [vmem:[%s4925_s1 + $0x8] sm:$0xff] (!%p163_p2)  ;;  %v246_v16 = vld [vmem:[%s4925_s1 + $0x10] sm:$0xff] (!%p163_p2)  ;;  %vm340_vm1 = vcmask (!%p163_p2), 64512   ;;  %v198_v59 = vlaneseq (!%p163_p2) }
   0x6   : > { %166 = sbr.rel (%p163_p2) target bundleno = 6327 (0x18b7), region = 36  ;;  %v4009_v17 = vpack.c.bf16 (!%p163_p2), %v245_v15, %v244_v14  ;;  %v247_v18 = vld [vmem:[%s4925_s1 + $0x18] sm:$0xff] (!%p163_p2)  ;;  %v3472_v27 = vld [vmem:[%s4926_s2 + $0x2] ss:$0 sm:$0xff] (!%p163_p2)  ;;  %v3473_v29 = vld [vmem:[%s4926_s2 + $0x3] ss:$0 sm:$0xff] (!%p163_p2) }
   0x7   : > { %v4013_v19 = vpack.c.bf16 (!%p163_p2), %v247_v18, %v246_v16  ;;  %v3474_v36 = vld [vmem:[%s4926_s2] ss:$0 sm:$0xff] (!%p163_p2)  ;;  %s4376_s9 = smov (!%p163_p2), 88   ;;  %s4377_s10 = smov (!%p163_p2), 96   ;;  %vm4491_vm2 = vmpackc.low (!%p163_p2), %vm340_vm1, %vm340_vm1  ;;  %v199_v60 = vand.u32 (!%p163_p2), 127, %v198_v59  ;;  %vm428_vm4 = vcmask (!%p163_p2), 130048  }
   0x8   : > { %4010 = vmatprep.subr.bf16.mxu0 (!%p163_p2), %v4009_v17  ;;  %s4378_s11 = smov (!%p163_p2), 120   ;;  %s4379_s12 = smov (!%p163_p2), 80   ;;  %v4381_v62 = vmov (!%p163_p2), -1e+09   ;;  %vm1632_vm5 = vcmask (!%p163_p2), 523264   ;;  %vm4389_vm6 = vmmov (!%p163_p2), 0  }
   0x9   : > { %4012 = vmatpush3.bf16.msra.mxu0 (!%p163_p2), %v4009_v17  ;;  %s4380_s13 = smov (!%p163_p2), 112   ;;  %vm200_vm3 = vcmp.lt.s32.totalorder (!%p163_p2), %v199_v60, 9  ;;  %s4382_s14 = smov (!%p163_p2), 64  }
   0xa   : > { %4014 = vmatprep.subr.bf16.mxu0 (!%p163_p2), %v4013_v19  ;;  %v4513_v63 = vsel (!%p163_p2), %vm200_vm3, 0.0, %v4381_v62  ;;  %s4384_s18 = smov (!%p163_p2), 104   ;;  %s4385_s19 = smov (!%p163_p2), 56  }
   0xb   : > { %s4386_s24 = smov (!%p163_p2), 48   ;;  %s4387_s27 = smov (!%p163_p2), 40  }
   0xd   : > { %s4932_s16 = smov (!%p187_p3, %s3464_s16), 1  ;;  %4016 = vmatpush3.bf16.msra.mxu0 %v4013_v19 }
   0xe   : > { %s3598_s17 = sshll.u32 %s4932_s16, 4 }
   0xf   : > { %s191_s20 = scalar_lea.vmem %s4924_s0, %s3598_s17  ;;  %s4383_s17 = smov 72  }
  0x10   : > { %v4430_v0 = vld [vmem:[%s191_s20] sm:$0xff]  ;;  %v4432_v1 = vld [vmem:[%s191_s20 + $0x8] sm:$0xff]  ;;  %s3471_s20 = sshll.u32 %s4932_s16, 3 }
  0x11   : > { %v205_v2 = vsel %vm204_vm0, %v4430_v0, 0.0  ;;  %v208_v3 = vsel %vm204_vm0, %v4432_v1, 0.0 }
  0x12   : > { %206 = vadd.xlane.f32.xlu0 %v205_v2 }
  0x16   : > { %209 = vadd.xlane.f32.xlu0 %v208_v3 }
  0x9f   : > { %v207_v4 = vpop.xlane.xlu0 %206 }
  0xa0   : > { %v212_v5 = vmul.f32 0.03125, %v207_v4 }
  0xa2   : > { %v214_v6 = vsub.f32 %v4430_v0, %v212_v5 }
  0xa3   : > { %v210_v7 = vpop.xlane.xlu0 %209 }
  0xa4   : > { %v213_v8 = vmul.f32 0.03125, %v210_v7  ;;  %v216_v9 = vmul.f32 %v214_v6, %v214_v6 }
  0xa6   : > { %v215_v10 = vsub.f32 %v4432_v1, %v213_v8  ;;  %v218_v11 = vsel %vm204_vm0, %v216_v9, 0.0 }
  0xa7   : > { %219 = vadd.xlane.f32.xlu1 %v218_v11 }
  0xa8   : > { %v217_v12 = vmul.f32 %v215_v10, %v215_v10 }
  0xaa   : > { %v221_v13 = vsel %vm204_vm0, %v217_v12, 0.0 }
  0xab   : > { %222 = vadd.xlane.f32.xlu1 %v221_v13 }
 0x134   : > { %v220_v20 = vpop.xlane.xlu1 %219 }
 0x135   : > { %v224_v21 = vmul.f32 0.03125, %v220_v20 }
 0x137   : > { %v226_v22 = vadd.f32 1e-05, %v224_v21 }
 0x138   : > { %v223_v23 = vpop.xlane.xlu1 %222 }
 0x139   : > { %4286 = vrsqrt.f32 %v226_v22  ;;  %v225_v24 = vmul.f32 0.03125, %v223_v23 }
 0x13b   : > { %v227_v25 = vadd.f32 1e-05, %v225_v24 }
 0x13d   : > { %4288 = vrsqrt.f32 %v227_v25 }
 0x143   : > { %v4287_v26 = vpop.eup %4286 }
 0x144   : > { %v230_v28 = vmul.f32 %v4287_v26, %v214_v6 }
 0x146   : > { %v236_v30 = vmul.f32 %v3472_v27, %v230_v28 }
 0x147   : > { %v4289_v31 = vpop.eup %4288 }
 0x148   : > { %v231_v32 = vmul.f32 %v4289_v31, %v215_v10  ;;  %v242_v33 = vadd.f32 %v3473_v29, %v236_v30 }
 0x14a   : > { %v237_v34 = vmul.f32 %v3472_v27, %v231_v32  ;;  %3753 = vmatprep.mubr.msk.f32.mxu0 %vm204_vm0, %v242_v33 }
 0x14c   : > { %v243_v35 = vadd.f32 %v3473_v29, %v237_v34 }
 0x14e   : > { %3754 = vmatmul.mubr.msk.f32.vlgmr.msra.gmra.mrb[0].mxu0 %vm204_vm0, %v243_v35 }
 0x221   : > { %v3755_v37 = vpop.f32.mrb[0].mxu0 }
 0x222   : > { %v4465_v38 = vadd.f32 %v3755_v37, %v3474_v36  ;;  %v325_v39 = vpop.f32.mrb[1].mxu0 }
 0x223   : > { %v4467_v40 = vadd.f32 %v3474_v36, %v325_v39 }
 0x225   : > { %3760 = vmatprep.mubr.msk.f32.mxu1 %vm340_vm1, %v4467_v40  ;;  %v4473_v41 = vpack.i.bf16 %v4465_v38, %v4467_v40 }
 0x227   : > { %4212 = vrot.lane.b32.xlu1 %v4473_v41, %s4376_s9  ;;  %4207 = vrot.lane.b32.xlu0 %v4473_v41, %s4377_s10 }
 0x22b   : > { %539 = vrot.lane.b32.xlu1 %v4467_v40, %s4378_s11  ;;  %4217 = vrot.lane.b32.xlu0 %v4473_v41, %s4379_s12 }
 0x22f   : > { %541 = vrot.lane.b32.xlu1 %v4465_v38, %s4378_s11  ;;  %908 = vrot.lane.b32.xlu0 %v4465_v38, %s4380_s13 }
 0x233   : > { %906 = vrot.lane.b32.xlu1 %v4467_v40, %s4380_s13 }
 0x299   : > { %v4213_v42 = vpop.permute.xlu1 %4212  ;;  %v4208_v43 = vpop.permute.xlu0 %4207 }
 0x29a   : > { %v4215_v44 = vunpack.i.h.bf16 %v4213_v42  ;;  %v4214_v45 = vunpack.i.l.bf16 %v4213_v42  ;;  %v4210_v46 = vunpack.i.h.bf16 %v4208_v43  ;;  %v4209_v47 = vunpack.i.l.bf16 %v4208_v43 }
 0x29c   : > { %v4017_v49 = vpack.c.bf16 %v4210_v46, %v4209_v47  ;;  %v4027_v50 = vpack.c.bf16 %v4215_v44, %v4214_v45 }
 0x29d   : > { %v4218_v51 = vpop.permute.xlu0 %4217  ;;  %v540_v52 = vpop.permute.xlu1 %539 }
 0x29e   : > { %4019 = vmatprep.subr.msk.bf16.mxu1 %vm4491_vm2, %v4017_v49  ;;  %v4220_v53 = vunpack.i.h.bf16 %v4218_v51  ;;  %v4219_v54 = vunpack.i.l.bf16 %v4218_v51 }
 0x29f   : > { %4022 = vmatpush3.bf16.xpose.msk.msra.mxu1 %vm4491_vm2, %v4017_v49 }
 0x2a0   : > { %4029 = vmatprep.subr.msk.bf16.mxu1 %vm4491_vm2, %v4027_v50  ;;  %v4037_v55 = vpack.c.bf16 %v4220_v53, %v4219_v54 }
 0x2a1   : > { %v542_v56 = vpop.permute.xlu1 %541  ;;  %v909_v58 = vpop.permute.xlu0 %908 }
 0x2a5   : > { %v907_v57 = vpop.permute.xlu1 %906 }
 0x2a6   : > { %3761 = vmatmul.mubr.msk.f32.vlgmr.msra.gmra.mrb[0].mxu1 %vm340_vm1, %v4465_v38 }
 0x2a7   : > { %4032 = vmatpush3.bf16.xpose.msk.msra.mxu1 %vm4491_vm2, %v4027_v50  ;;  %3774 = vmatprep.mubr.msk.f32.mxu1 %vm340_vm1, %v540_v52 }
 0x2a8   : > { %4039 = vmatprep.subr.msk.bf16.mxu1 %vm4491_vm2, %v4037_v55 }
 0x2ae   : > { %3775 = vmatmul.mubr.msk.f32.vlgmr.msra.gmra.mrb[2].mxu1 %vm340_vm1, %v542_v56 }
 0x2af   : > { %4042 = vmatpush3.bf16.xpose.msk.msra.mxu1 %vm4491_vm2, %v4037_v55  ;;  %3798 = vmatprep.mubr.msk.f32.mxu1 %vm340_vm1, %v907_v57 }
 0x2b6   : > { %3799 = vmatmul.mubr.msk.f32.vlgmr.msra.gmra.mrb[4].mxu1 %vm340_vm1, %v909_v58 }
 0x379   : > { %v3762_v61 = vpop.f32.mrb[0].mxu1 }
 0x37a   : > { %v425_v2 = vmul.f32 0.35355338, %v3762_v61  ;;  %v415_v3 = vpop.f32.mrb[1].mxu1 }
 0x37b   : > { %v424_v4 = vmul.f32 0.35355338, %v415_v3 }
 0x37c   : > { %v427_v5 = vadd.f32 %v425_v2, %v4513_v63 }
 0x37d   : > { %v426_v6 = vadd.f32 %v424_v4, %v4513_v63 }
 0x37e   : > { %v432_v7 = vsel %vm428_vm4, %v427_v5, -inf }
 0x37f   : > { %433 = vmax.xlane.f32.xlu0 %v432_v7  ;;  %v429_v8 = vsel %vm428_vm4, %v426_v6, -inf }
 0x380   : > { %430 = vmax.xlane.f32.xlu1 %v429_v8 }
 0x381   : > { %v3776_v9 = vpop.f32.mrb[2].mxu1 }
 0x382   : > { %v621_v10 = vpop.f32.mrb[3].mxu1  ;;  %v631_v11 = vmul.f32 0.35355338, %v3776_v9 }
 0x383   : > { %v630_v12 = vmul.f32 0.35355338, %v621_v10 }
 0x384   : > { %v633_v15 = vadd.f32 %v631_v11, %v4513_v63 }
 0x385   : > { %v632_v13 = vadd.f32 %v630_v12, %v4513_v63 }
 0x386   : > { %v637_v18 = vsel %vm428_vm4, %v633_v15, -inf }
 0x387   : > { %v634_v14 = vsel %vm428_vm4, %v632_v13, -inf }
 0x388   : > { %635 = vmax.xlane.f32.xlu0 %v634_v14 }
 0x389   : > { %v3800_v16 = vpop.f32.mrb[4].mxu1 }
 0x38a   : > { %v988_v17 = vpop.f32.mrb[5].mxu1  ;;  %v998_v44 = vmul.f32 0.35355338, %v3800_v16 }
 0x38b   : > { %v997_v42 = vmul.f32 0.35355338, %v988_v17 }
 0x38c   : > { %638 = vmax.xlane.f32.xlu0 %v637_v18  ;;  %v1000_v46 = vadd.f32 %v998_v44, %v4513_v63 }
 0x38d   : > { %v999_v43 = vadd.f32 %v997_v42, %v4513_v63 }
 0x38e   : > { %v1004_v47 = vsel %vm428_vm4, %v1000_v46, -inf }
 0x38f   : > { %v1001_v45 = vsel %vm428_vm4, %v999_v43, -inf }
 0x40c   : > { %v434_v19 = vpop.xlane.xlu0 %433 }
 0x40d   : > { %v436_v20 = vsub.f32 %v427_v5, %v434_v19  ;;  %v431_v21 = vpop.xlane.xlu1 %430 }
 0x40e   : > { %v435_v22 = vsub.f32 %v426_v6, %v431_v21 }
 0x40f   : > { %v439_v23 = vmul.f32 1.442695, %v436_v20 }
 0x410   : > { %v437_v24 = vmul.f32 1.442695, %v435_v22  ;;  %v743_v22 = vld [vmem:[%s4925_s1 + $0x28] sm:$0xff] }
 0x411   : > { %4290 = vpow2.f32 %v439_v23  ;;  %v538_v23 = vld [vmem:[%s4925_s1 + $0x20] sm:$0xff] }
 0x412   : > { %4292 = vpow2.f32 %v437_v24 }
 0x415   : > { %v636_v25 = vpop.xlane.xlu0 %635 }
 0x416   : > { %v640_v26 = vsub.f32 %v632_v13, %v636_v25 }
 0x418   : > { %v642_v27 = vmul.f32 1.442695, %v640_v26 }
 0x419   : > { %v639_v28 = vpop.xlane.xlu0 %638 }
 0x41a   : > { %4294 = vpow2.f32 %v642_v27  ;;  %v641_v29 = vsub.f32 %v633_v15, %v639_v28 }
 0x41b   : > { %v4291_v30 = vpop.eup %4290 }
 0x41c   : > { %v4293_v31 = vpop.eup %4292  ;;  %v644_v32 = vmul.f32 1.442695, %v641_v29  ;;  %v444_v33 = vsel %vm428_vm4, %v4291_v30, 0.0 }
 0x41d   : > { %445 = vadd.xlane.f32.xlu0 %v444_v33  ;;  %v441_v34 = vsel %vm428_vm4, %v4293_v31, 0.0 }
 0x41e   : > { %4296 = vpow2.f32 %v644_v32  ;;  %442 = vadd.xlane.f32.xlu1 %v441_v34 }
 0x424   : > { %v4295_v35 = vpop.eup %4294 }
 0x425   : > { %v646_v36 = vsel %vm428_vm4, %v4295_v35, 0.0 }
 0x426   : > { %647 = vadd.xlane.f32.xlu1 %v646_v36 }
 0x428   : > { %v4297_v37 = vpop.eup %4296 }
 0x429   : > { %v649_v39 = vsel %vm428_vm4, %v4297_v37, 0.0 }
 0x42a   : > { %650 = vadd.xlane.f32.xlu0 %v649_v39 }
 0x437   : > { %4222 = vrot.lane.b32.xlu1 %v4473_v41, %s4382_s14 }
 0x43b   : > { %4232 = vrot.lane.b32.xlu1 %v4473_v41, %s4383_s17 }
 0x43f   : > { %1194 = vrot.lane.b32.xlu1 %v4467_v40, %s4384_s18 }
 0x440   : > { %4227 = vrot.lane.b32.xlu0 %v4473_v41, %s4385_s19 }
 0x443   : > { %1196 = vrot.lane.b32.xlu1 %v4465_v38, %s4384_s18 }
 0x45f   : > { %1002 = vmax.xlane.f32.xlu0 %v1001_v45 }
 0x467   : > { %1005 = vmax.xlane.f32.xlu1 %v1004_v47 }
 0x4aa   : > { %v446_v49 = vpop.xlane.xlu0 %445 }
 0x4ab   : > { %v443_v40 = vpop.xlane.xlu1 %442 }
 0x4ac   : > { %4298 = vrcp.f32 %v443_v40 }
 0x4ad   : > { %4300 = vrcp.f32 %v446_v49  ;;  %v1110_v49 = vld [vmem:[%s4925_s1 + $0x30] sm:$0xff] }
 0x4b3   : > { %v648_v50 = vpop.xlane.xlu1 %647 }
 0x4b4   : > { %4302 = vrcp.f32 %v648_v50 }
 0x4b6   : > { %v4299_v51 = vpop.eup %4298 }
 0x4b7   : > { %v651_v38 = vpop.xlane.xlu0 %650  ;;  %v4223_v52 = vpop.permute.xlu1 %4222  ;;  %v449_v53 = vmul.f32 %v4299_v51, %v4293_v31 }
 0x4b8   : > { %4304 = vrcp.f32 %v651_v38  ;;  %v4225_v54 = vunpack.i.h.bf16 %v4223_v52  ;;  %v4224_v55 = vunpack.i.l.bf16 %v4223_v52  ;;  %v4301_v57 = vpop.eup %4300 }
 0x4b9   : > { %3767 = vmatprep.mubr.msk.f32.mxu0 %vm428_vm4, %v449_v53  ;;  %v450_v4 = vmul.f32 %v4301_v57, %v4291_v30 }
 0x4ba   : > { %v4023_v56 = vpack.c.bf16 %v4225_v54, %v4224_v55 }
 0x4bb   : > { %v4228_v58 = vpop.permute.xlu0 %4227  ;;  %v4233_v59 = vpop.permute.xlu1 %4232 }
 0x4bc   : > { %v4230_v60 = vunpack.i.h.bf16 %v4228_v58  ;;  %v4229_v61 = vunpack.i.l.bf16 %v4228_v58  ;;  %v4235_v62 = vunpack.i.h.bf16 %v4233_v59  ;;  %v4234_v2 = vunpack.i.l.bf16 %v4233_v59  ;;  %4024 = vmatprep.subr.bf16.mxu0 %v4023_v56 }
 0x4bd   : > { %4026 = vmatpush3.bf16.msra.mxu0 %v4023_v56 }
 0x4be   : > { %v4303_v3 = vpop.eup %4302  ;;  %v4033_v5 = vpack.c.bf16 %v4230_v60, %v4229_v61  ;;  %v4047_v6 = vpack.c.bf16 %v4235_v62, %v4234_v2 }
 0x4bf   : > { %v1195_v7 = vpop.permute.xlu1 %1194  ;;  %v654_v8 = vmul.f32 %v4303_v3, %v4295_v35 }
 0x4c0   : > { %3768 = vmatmul.mubr.msk.f32.vlgmr.msra.gmra.mrb[2].mxu0 %vm428_vm4, %v450_v4  ;;  %4034 = vmatprep.subr.bf16.mxu0 %v4033_v5 }
 0x4c1   : > { %4049 = vmatprep.subr.msk.bf16.mxu1 %vm4491_vm2, %v4047_v6  ;;  %3817 = vmatprep.mubr.msk.f32.mxu1 %vm340_vm1, %v1195_v7 }
 0x4c2   : > { %v4305_v9 = vpop.eup %4304  ;;  %4036 = vmatpush3.bf16.msra.mxu0 %v4033_v5  ;;  %3781 = vmatprep.mubr.msk.f32.mxu0 %vm428_vm4, %v654_v8 }
 0x4c3   : > { %v655_v10 = vmul.f32 %v4305_v9, %v4297_v37  ;;  %4052 = vmatpush3.bf16.xpose.msk.msra.mxu1 %vm4491_vm2, %v4047_v6  ;;  %v1197_v11 = vpop.permute.xlu1 %1196  ;;  %3784 = vmatprep.subr.mxu0 %v743_v22  ;;  %v1398_v6 = vld [vmem:[%s4925_s1 + $0x38] sm:$0xff] }
 0x4c5   : > { %3782 = vmatmul.mubr.msk.f32.vlgmr.msra.gmra.mrb[4].mxu0 %vm428_vm4, %v655_v10 }
 0x4c6   : > { %3785 = vmatpush3.msra.mxu0 %v743_v22 }
 0x4c7   : > { %3789 = vmatprep.subr.mxu0 %v538_v23 }
 0x4ca   : > { %3818 = vmatmul.mubr.msk.f32.vlgmr.msra.gmra.mrb[6].mxu1 %vm340_vm1, %v1197_v11 }
 0x4ec   : > { %v1003_v12 = vpop.xlane.xlu0 %1002 }
 0x4ed   : > { %v1007_v13 = vsub.f32 %v999_v43, %v1003_v12 }
 0x4ef   : > { %v1009_v16 = vmul.f32 1.442695, %v1007_v13  ;;  %v3509_v13 = vld [vmem:[%s4926_s2 + $0x1] ss:$0 sm:$0xff] }
 0x4f4   : > { %v1006_v14 = vpop.xlane.xlu1 %1005 }
 0x4f5   : > { %v1008_v15 = vsub.f32 %v1000_v46, %v1006_v14 }
 0x4f7   : > { %v1011_v17 = vmul.f32 1.442695, %v1008_v15 }
 0x4f9   : > { %4306 = vpow2.f32 %v1011_v17 }
 0x4fa   : > { %4308 = vpow2.f32 %v1009_v16 }
 0x503   : > { %v4307_v18 = vpop.eup %4306 }
 0x504   : > { %v1016_v19 = vsel %vm428_vm4, %v4307_v18, 0.0  ;;  %v4309_v20 = vpop.eup %4308 }
 0x505   : > { %1017 = vadd.xlane.f32.xlu0 %v1016_v19  ;;  %v1013_v21 = vsel %vm428_vm4, %v4309_v20, 0.0 }
 0x509   : > { %1014 = vadd.xlane.f32.xlu0 %v1013_v21 }
 0x51f   : > { %4237 = vrot.lane.b32.xlu0 %v4473_v41, %s4386_s24 }
 0x592   : > { %v1018_v24 = vpop.xlane.xlu0 %1017 }
 0x593   : > { %v3769_v25 = vpop.f32.mrb[2].mxu0 }
 0x594   : > { %v529_v26 = vpop.f32.mrb[3].mxu0 }
 0x596   : > { %v1015_v27 = vpop.xlane.xlu0 %1014 }
 0x597   : > { %4310 = vrcp.f32 %v1015_v27 }
 0x598   : > { %4312 = vrcp.f32 %v1018_v24  ;;  %v3783_v28 = vpop.f32.mrb[4].mxu0 }
 0x599   : > { %v734_v29 = vpop.f32.mrb[5].mxu0 }
 0x59a   : > { %v4238_v30 = vpop.permute.xlu0 %4237  ;;  %3786 = vmatprep.mubr.msk.f32.mxu0 %vm340_vm1, %v734_v29  ;;  %v1531_v29 = vld [vmem:[%s4925_s1 + $0x40] sm:$0xff] }
 0x59b   : > { %v4240_v31 = vunpack.i.h.bf16 %v4238_v30  ;;  %v4239_v32 = vunpack.i.l.bf16 %v4238_v30  ;;  %3787 = vmatmul.mubr.msk.f32.vlgmr.msra.gmra.mrb[6].mxu0 %vm340_vm1, %v3783_v28  ;;  %v1532_v30 = vld [vmem:[%s4925_s1 + $0x48] sm:$0xff] }
 0x59c   : > { %3791 = vmatprep.mubr.msk.f32.mxu0 %vm340_vm1, %v529_v26  ;;  %3790 = vmatpush3.msra.mxu0 %v538_v23 }
 0x59d   : > { %v4043_v33 = vpack.c.bf16 %v4240_v31, %v4239_v32  ;;  %v3819_v34 = vpop.f32.mrb[6].mxu1  ;;  %v4057_v31 = vpack.c.bf16 %v1532_v30, %v1531_v29  ;;  %v1533_v32 = vld [vmem:[%s4925_s1 + $0x50] sm:$0xff] }
 0x59e   : > { %v1276_v35 = vpop.f32.mrb[7].mxu1  ;;  %v1286_v36 = vmul.f32 0.35355338, %v3819_v34  ;;  %v3524_v30 = vld [vmem:[%s4925_s1 + $0xb0] sm:$0xff] }
 0x59f   : > { %v1285_v37 = vmul.f32 0.35355338, %v1276_v35  ;;  %4044 = vmatprep.subr.bf16.mxu0 %v4043_v33  ;;  %4058 = vmatprep.subr.bf16.mxu1 %v4057_v31  ;;  %v1623_v35 = vld [vmem:[%s4925_s1 + $0x60] sm:$0xff] }
 0x5a0   : > { %v1288_v46 = vadd.f32 %v1286_v36, %v4513_v63  ;;  %4060 = vmatpush3.bf16.msra.mxu1 %v4057_v31  ;;  %v1624_v36 = vld [vmem:[%s4925_s1 + $0x68] sm:$0xff]  ;;  %v3525_v31 = vld [vmem:[%s4925_s1 + $0xb8] sm:$0xff] }
 0x5a1   : > { %v4311_v39 = vpop.eup %4310  ;;  %v1287_v42 = vadd.f32 %v1285_v37, %v4513_v63  ;;  %v1625_v37 = vld [vmem:[%s4925_s1 + $0x70] sm:$0xff] }
 0x5a2   : > { %v4313_v43 = vpop.eup %4312  ;;  %v1021_v44 = vmul.f32 %v4311_v39, %v4309_v20  ;;  %v1292_v40 = vsel %vm428_vm4, %v1288_v46, -inf  ;;  %v4065_v39 = vpack.c.bf16 %v1624_v36, %v1623_v35 }
 0x5a3   : > { %v1289_v45 = vsel %vm428_vm4, %v1287_v42, -inf  ;;  %3792 = vmatmul.mubr.msk.f32.vlgmr.msra.gmra.mrb[6].mxu0 %vm340_vm1, %v3769_v25  ;;  %v1022_v47 = vmul.f32 %v4313_v43, %v4307_v18 }
 0x5a4   : > { %1290 = vmax.xlane.f32.xlu1 %v1289_v45  ;;  %4046 = vmatpush3.bf16.msra.mxu0 %v4043_v33  ;;  %v1534_v33 = vld [vmem:[%s4925_s1 + $0x58] sm:$0xff]  ;;  %v1628_v45 = vld [vmem:[%s4925_s1 + $0x88] sm:$0xff] }
 0x5a5   : > { %3805 = vmatprep.mubr.msk.f32.mxu0 %vm428_vm4, %v1021_v44  ;;  %3808 = vmatprep.subr.mxu0 %v1110_v49  ;;  %v4061_v34 = vpack.c.bf16 %v1534_v33, %v1533_v32  ;;  %v1627_v44 = vld [vmem:[%s4925_s1 + $0x80] sm:$0xff]  ;;  %v4085_v32 = vpack.c.bf16 %v3525_v31, %v3524_v30 }
 0x5a7   : > { %3806 = vmatmul.mubr.msk.f32.vlgmr.msra.gmra.mrb[8].mxu0 %vm428_vm4, %v1022_v47  ;;  %4062 = vmatprep.subr.bf16.mxu1 %v4061_v34 }
 0x5a8   : > { %1293 = vmax.xlane.f32.xlu1 %v1292_v40  ;;  %3809 = vmatpush3.msra.mxu0 %v1110_v49 }
 0x5a9   : > { %4064 = vmatpush3.bf16.msra.mxu1 %v4061_v34 }
 0x631   : > { %v1291_v50 = vpop.xlane.xlu1 %1290 }
 0x632   : > { %v1295_v51 = vsub.f32 %v1287_v42, %v1291_v50  ;;  %v1626_v42 = vld [vmem:[%s4925_s1 + $0x78] sm:$0xff] }
 0x633   : > { %v4069_v43 = vpack.c.bf16 %v1626_v42, %v1625_v37 }
 0x634   : > { %v1297_v53 = vmul.f32 1.442695, %v1295_v51 }
 0x635   : > { %v1294_v38 = vpop.xlane.xlu1 %1293 }
 0x636   : > { %v1296_v52 = vsub.f32 %v1288_v46, %v1294_v38  ;;  %v4073_v46 = vpack.c.bf16 %v1628_v45, %v1627_v44  ;;  %v3521_v45 = vld [vmem:[%s4926_s2 + $0xb] ss:$0 sm:$0xff] }
 0x638   : > { %v1299_v54 = vmul.f32 1.442695, %v1296_v52 }
 0x63a   : > { %4314 = vpow2.f32 %v1299_v54 }
 0x63b   : > { %4316 = vpow2.f32 %v1297_v53  ;;  %v3510_v53 = vld [vmem:[%s4926_s2 + $0x4] ss:$0 sm:$0xff] }
 0x644   : > { %v4315_v55 = vpop.eup %4314 }
 0x645   : > { %v1304_v56 = vsel %vm428_vm4, %v4315_v55, 0.0  ;;  %v4317_v57 = vpop.eup %4316 }
 0x646   : > { %1305 = vadd.xlane.f32.xlu1 %v1304_v56  ;;  %v1301_v58 = vsel %vm428_vm4, %v4317_v57, 0.0 }
 0x64a   : > { %1302 = vadd.xlane.f32.xlu1 %v1301_v58 }
 0x65b   : > { %4242 = vrot.lane.b32.xlu1 %v4473_v41, %s4387_s27 }
 0x67a   : > { %v3807_v59 = vpop.f32.mrb[8].mxu0 }
 0x67b   : > { %v1101_v60 = vpop.f32.mrb[9].mxu0 }
 0x67c   : > { %3810 = vmatprep.mubr.msk.f32.mxu0 %vm340_vm1, %v1101_v60 }
 0x67d   : > { %3811 = vmatmul.mubr.msk.f32.vlgmr.msra.gmra.mrb[6].mxu0 %vm340_vm1, %v3807_v59 }
 0x6d3   : > { %v1306_v61 = vpop.xlane.xlu1 %1305 }
 0x6d4   : > { %4318 = vrcp.f32 %v1306_v61 }
 0x6d7   : > { %v1303_v62 = vpop.xlane.xlu1 %1302 }
 0x6d8   : > { %4320 = vrcp.f32 %v1303_v62  ;;  %v1629_v62 = vld [vmem:[%s4925_s1 + $0x90] sm:$0xff] }
 0x6db   : > { %v4243_v2 = vpop.permute.xlu1 %4242 }
 0x6dc   : > { %v4245_v3 = vunpack.i.h.bf16 %v4243_v2  ;;  %v4244_v4 = vunpack.i.l.bf16 %v4243_v2  ;;  %v1630_v2 = vld [vmem:[%s4925_s1 + $0x98] sm:$0xff] }
 0x6de   : > { %v4053_v5 = vpack.c.bf16 %v4245_v3, %v4244_v4  ;;  %v4319_v41 = vpop.eup %4318  ;;  %v4077_v3 = vpack.c.bf16 %v1630_v2, %v1629_v62  ;;  %v3512_v4 = vld [vmem:[%s4926_s2 + $0x6] ss:$0 sm:$0xff] }
 0x6df   : > { %v1310_v9 = vmul.f32 %v4319_v41, %v4315_v55  ;;  %v3511_v55 = vld [vmem:[%s4926_s2 + $0x5] ss:$0 sm:$0xff] }
 0x6e0   : > { %4054 = vmatprep.subr.bf16.mxu0 %v4053_v5 }
 0x6e1   : > { %4056 = vmatpush3.bf16.msra.mxu0 %v4053_v5 }
 0x6e2   : > { %v4321_v7 = vpop.eup %4320  ;;  %3827 = vmatprep.subr.mxu0 %v1398_v6 }
 0x6e3   : > { %v1309_v8 = vmul.f32 %v4321_v7, %v4317_v57 }
 0x6e5   : > { %3824 = vmatprep.mubr.msk.f32.mxu0 %vm428_vm4, %v1309_v8 }
 0x6e6   : > { %3825 = vmatmul.mubr.msk.f32.vlgmr.msra.gmra.mrb[10].mxu0 %vm428_vm4, %v1310_v9 }
 0x6e7   : > { %3828 = vmatpush3.msra.mxu0 %v1398_v6 }
 0x6e8   : > { %4066 = vmatprep.subr.bf16.mxu0 %v4065_v39 }
 0x7b9   : > { %v3826_v10 = vpop.f32.mrb[10].mxu0 }
 0x7ba   : > { %v1389_v11 = vpop.f32.mrb[11].mxu0 }
 0x7bb   : > { %3829 = vmatprep.mubr.msk.f32.mxu0 %vm340_vm1, %v1389_v11  ;;  %v3517_v11 = vld [vmem:[%s4926_s2 + $0x7] ss:$0 sm:$0xff] }
 0x7bc   : > { %3830 = vmatmul.mubr.msk.f32.vlgmr.msra.gmra.mrb[6].mxu0 %vm340_vm1, %v3826_v10 }
 0x7bd   : > { %4068 = vmatpush3.bf16.msra.mxu0 %v4065_v39 }
 0x7be   : > { %4070 = vmatprep.subr.bf16.mxu0 %v4069_v43 }
 0x7c1   : > { %4072 = vmatpush3.bf16.msra.mxu0 %v4069_v43  ;;  %v3520_v43 = vld [vmem:[%s4926_s2 + $0xa] ss:$0 sm:$0xff] }
 0x7c2   : > { %4074 = vmatprep.subr.bf16.mxu0 %v4073_v46 }
 0x7c5   : > { %4076 = vmatpush3.bf16.msra.mxu0 %v4073_v46 }
 0x7c6   : > { %4078 = vmatprep.subr.bf16.mxu0 %v4077_v3 }
 0x7c9   : > { %4080 = vmatpush3.bf16.msra.mxu0 %v4077_v3 }
 0x88f   : > { %v3831_v12 = vpop.f32.mrb[6].mxu0 }
 0x890   : > { %v1484_v14 = vadd.f32 %v3831_v12, %v4432_v1  ;;  %v1471_v15 = vpop.f32.mrb[7].mxu0 }
 0x891   : > { %v1483_v16 = vadd.f32 %v1471_v15, %v4430_v0 }
 0x892   : > { %v4592_v17 = vadd.f32 %v3509_v13, %v1484_v14 }
 0x893   : > { %v4594_v18 = vadd.f32 %v3509_v13, %v1483_v16 }
 0x894   : > { %v1496_v19 = vsel %vm204_vm0, %v4592_v17, 0.0 }
 0x895   : > { %1497 = vadd.xlane.f32.xlu1 %v1496_v19  ;;  %v1493_v20 = vsel %vm204_vm0, %v4594_v18, 0.0 }
 0x896   : > { %1494 = vadd.xlane.f32.xlu0 %v1493_v20 }
 0x922   : > { %v1498_v21 = vpop.xlane.xlu1 %1497 }
 0x923   : > { %v1500_v22 = vmul.f32 0.03125, %v1498_v21  ;;  %v1495_v23 = vpop.xlane.xlu0 %1494 }
 0x924   : > { %v1499_v24 = vmul.f32 0.03125, %v1495_v23 }
 0x925   : > { %v1502_v1 = vsub.f32 %v4592_v17, %v1500_v22 }
 0x926   : > { %v1501_v0 = vsub.f32 %v4594_v18, %v1499_v24 }
 0x927   : > { %v1504_v27 = vmul.f32 %v1502_v1, %v1502_v1 }
 0x928   : > { %v1503_v25 = vmul.f32 %v1501_v0, %v1501_v0 }
 0x929   : > { %v1508_v28 = vsel %vm204_vm0, %v1504_v27, 0.0  ;;  %v3522_v27 = vld [vmem:[%s4925_s1 + $0xa0] sm:$0xff] }
 0x92a   : > { %v1505_v26 = vsel %vm204_vm0, %v1503_v25, 0.0 }
 0x92b   : > { %1506 = vadd.xlane.f32.xlu0 %v1505_v26 }
 0x92f   : > { %1509 = vadd.xlane.f32.xlu0 %v1508_v28  ;;  %v3523_v28 = vld [vmem:[%s4925_s1 + $0xa8] sm:$0xff] }
 0x930   : > { %v4081_v29 = vpack.c.bf16 %v3523_v28, %v3522_v27 }
 0x932   : > { %4082 = vmatprep.subr.bf16.mxu1 %v4081_v29 }
 0x9b8   : > { %v1507_v47 = vpop.xlane.xlu0 %1506 }
 0x9b9   : > { %v1511_v40 = vmul.f32 0.03125, %v1507_v47 }
 0x9bb   : > { %v1513_v49 = vadd.f32 1e-05, %v1511_v40 }
 0x9bc   : > { %v1510_v50 = vpop.xlane.xlu0 %1509 }
 0x9bd   : > { %4322 = vrsqrt.f32 %v1513_v49  ;;  %v1512_v51 = vmul.f32 0.03125, %v1510_v50 }
 0x9bf   : > { %v1514_v38 = vadd.f32 1e-05, %v1512_v51 }
 0x9c1   : > { %4324 = vrsqrt.f32 %v1514_v38  ;;  %v3527_v38 = vld [vmem:[%s4926_s2 + $0x8] ss:$0 sm:$0xff] }
 0x9c7   : > { %v4323_v52 = vpop.eup %4322 }
 0x9c8   : > { %v1517_v54 = vmul.f32 %v4323_v52, %v1501_v0 }
 0x9ca   : > { %v1523_v56 = vmul.f32 %v3510_v53, %v1517_v54 }
 0x9cb   : > { %v4325_v57 = vpop.eup %4324 }
 0x9cc   : > { %v1518_v58 = vmul.f32 %v4325_v57, %v1502_v1  ;;  %v1529_v59 = vadd.f32 %v3511_v55, %v1523_v56 }
 0x9ce   : > { %v1524_v60 = vmul.f32 %v3510_v53, %v1518_v58  ;;  %3840 = vmatprep.mubr.msk.f32.mxu1 %vm204_vm0, %v1529_v59 }
 0x9d0   : > { %v1530_v61 = vadd.f32 %v3511_v55, %v1524_v60 }
 0x9d2   : > { %3841 = vmatmul.mubr.msk.f32.vlgmr.msra.gmra.mrb[8].mxu1 %vm204_vm0, %v1530_v61 }
 0x9d3   : > { %4084 = vmatpush3.bf16.msra.mxu1 %v4081_v29 }
 0x9d4   : > { %4086 = vmatprep.subr.bf16.mxu1 %v4085_v32 }
 0x9d7   : > { %4088 = vmatpush3.bf16.msra.mxu1 %v4085_v32 }
 0xaa5   : > { %v3842_v5 = vpop.f32.mrb[8].mxu1 }
 0xaa6   : > { %v1618_v6 = vadd.f32 %v3842_v5, %v3512_v4  ;;  %v1612_v41 = vpop.f32.mrb[9].mxu1 }
 0xaa7   : > { %v1613_v7 = vadd.f32 %v3512_v4, %v1612_v41 }
 0xaa8   : > { %v1622_v9 = vmax.f32 %v1618_v6, 0.0 }
 0xaa9   : > { %v1621_v8 = vmax.f32 %v1613_v7, 0.0 }
 0xaab   : > { %3859 = vmatprep.mubr.msk.f32.mxu0 %vm1632_vm5, %v1621_v8 }
 0xaac   : > { %3860 = vmatmul.mubr.msk.f32.vlgmr.msra.gmra.mrb[12].mxu0 %vm1632_vm5, %v1622_v9 }
 0xb7f   : > { %v3861_v10 = vpop.f32.mrb[12].mxu0 }
 0xb80   : > { %v1705_v12 = vpop.f32.mrb[13].mxu0  ;;  %v1715_v13 = vadd.f32 %v3861_v10, %v4592_v17 }
 0xb81   : > { %v1714_v14 = vadd.f32 %v1705_v12, %v4594_v18 }
 0xb82   : > { %v4660_v16 = vadd.f32 %v3517_v11, %v1715_v13 }
 0xb83   : > { %v4658_v15 = vadd.f32 %v3517_v11, %v1714_v14 }
 0xb84   : > { %v1728_v20 = vsel %vm204_vm0, %v4660_v16, 0.0 }
 0xb85   : > { %v1725_v19 = vsel %vm204_vm0, %v4658_v15, 0.0 }
 0xb86   : > { %1726 = vadd.xlane.f32.xlu0 %v1725_v19 }
 0xb8a   : > { %1729 = vadd.xlane.f32.xlu0 %v1728_v20 }
 0xc13   : > { %v1727_v21 = vpop.xlane.xlu0 %1726 }
 0xc14   : > { %v1731_v22 = vmul.f32 0.03125, %v1727_v21 }
 0xc16   : > { %v1733_v23 = vsub.f32 %v4658_v15, %v1731_v22 }
 0xc17   : > { %v1730_v24 = vpop.xlane.xlu0 %1729 }
 0xc18   : > { %v1732_v17 = vmul.f32 0.03125, %v1730_v24  ;;  %v1735_v1 = vmul.f32 %v1733_v23, %v1733_v23 }
 0xc1a   : > { %v1734_v18 = vsub.f32 %v4660_v16, %v1732_v17  ;;  %v1737_v0 = vsel %vm204_vm0, %v1735_v1, 0.0 }
 0xc1b   : > { %1738 = vadd.xlane.f32.xlu0 %v1737_v0 }
 0xc1c   : > { %v1736_v25 = vmul.f32 %v1734_v18, %v1734_v18 }
 0xc1e   : > { %v1740_v26 = vsel %vm204_vm0, %v1736_v25, 0.0 }
 0xc1f   : > { %1741 = vadd.xlane.f32.xlu1 %v1740_v26 }
 0xca8   : > { %v1739_v33 = vpop.xlane.xlu0 %1738 }
 0xca9   : > { %v1743_v34 = vmul.f32 0.03125, %v1739_v33 }
 0xcab   : > { %v1745_v35 = vadd.f32 1e-05, %v1743_v34 }
 0xcac   : > { %v1742_v36 = vpop.xlane.xlu1 %1741 }
 0xcad   : > { %4326 = vrsqrt.f32 %v1745_v35  ;;  %v1744_v37 = vmul.f32 0.03125, %v1742_v36 }
 0xcaf   : > { %v1746_v39 = vadd.f32 1e-05, %v1744_v37 }
 0xcb1   : > { %4328 = vrsqrt.f32 %v1746_v39 }
 0xcb7   : > { %v4327_v42 = vpop.eup %4326 }
 0xcb8   : > { %v1749_v44 = vmul.f32 %v4327_v42, %v1733_v23 }
 0xcba   : > { %v1755_v46 = vmul.f32 %v3520_v43, %v1749_v44 }
 0xcbb   : > { %v4329_v47 = vpop.eup %4328 }
 0xcbc   : > { %v1750_v40 = vmul.f32 %v4329_v47, %v1734_v18  ;;  %v1761_v49 = vadd.f32 %v3521_v45, %v1755_v46 }
 0xcbe   : > { %v1756_v50 = vmul.f32 %v3520_v43, %v1750_v40  ;;  %3870 = vmatprep.mubr.msk.f32.mxu1 %vm204_vm0, %v1761_v49 }
 0xcc0   : > { %v1762_v51 = vadd.f32 %v3521_v45, %v1756_v50 }
 0xcc2   : > { %3871 = vmatmul.mubr.msk.f32.vlgmr.msra.gmra.mrb[10].mxu1 %vm204_vm0, %v1762_v51 }
 0xd95   : > { %v3872_v52 = vpop.f32.mrb[10].mxu1 }
 0xd96   : > { %v4693_v53 = vadd.f32 %v3872_v52, %v3527_v38  ;;  %v1845_v54 = vpop.f32.mrb[11].mxu1 }
 0xd97   : > { %v4695_v55 = vadd.f32 %v3527_v38, %v1845_v54 }
 0xd99   : > { %3877 = vmatprep.mubr.msk.f32.mxu1 %vm340_vm1, %v4695_v55  ;;  %v4701_v56 = vpack.i.bf16 %v4693_v53, %v4695_v55 }
 0xd9b   : > { %4252 = vrot.lane.b32.xlu1 %v4701_v56, %s4376_s9  ;;  %4247 = vrot.lane.b32.xlu0 %v4701_v56, %s4377_s10  ;;  %s195_s10 = scalar_lea.vmem %s4928_s4, %s3471_s20 }
 0xd9f   : > { %2057 = vrot.lane.b32.xlu1 %v4695_v55, %s4378_s11  ;;  %4257 = vrot.lane.b32.xlu0 %v4701_v56, %s4379_s12 }
 0xda3   : > { %2059 = vrot.lane.b32.xlu1 %v4693_v53, %s4378_s11  ;;  %2426 = vrot.lane.b32.xlu0 %v4693_v53, %s4380_s13 }
 0xda7   : > { %2424 = vrot.lane.b32.xlu1 %v4695_v55, %s4380_s13 }
 0xe0d   : > { %v4253_v57 = vpop.permute.xlu1 %4252  ;;  %v4248_v58 = vpop.permute.xlu0 %4247 }
 0xe0e   : > { %v4255_v59 = vunpack.i.h.bf16 %v4253_v57  ;;  %v4254_v60 = vunpack.i.l.bf16 %v4253_v57  ;;  %v4250_v61 = vunpack.i.h.bf16 %v4248_v58  ;;  %v4249_v62 = vunpack.i.l.bf16 %v4248_v58 }
 0xe10   : > { %v4089_v2 = vpack.c.bf16 %v4250_v61, %v4249_v62  ;;  %v4099_v3 = vpack.c.bf16 %v4255_v59, %v4254_v60 }
 0xe11   : > { %v4258_v4 = vpop.permute.xlu0 %4257  ;;  %v2058_v5 = vpop.permute.xlu1 %2057 }
 0xe12   : > { %4091 = vmatprep.subr.msk.bf16.mxu1 %vm4491_vm2, %v4089_v2  ;;  %v4260_v6 = vunpack.i.h.bf16 %v4258_v4  ;;  %v4259_v41 = vunpack.i.l.bf16 %v4258_v4 }
 0xe13   : > { %4094 = vmatpush3.bf16.xpose.msk.msra.mxu1 %vm4491_vm2, %v4089_v2 }
 0xe14   : > { %4101 = vmatprep.subr.msk.bf16.mxu1 %vm4491_vm2, %v4099_v3  ;;  %v4109_v7 = vpack.c.bf16 %v4260_v6, %v4259_v41 }
 0xe15   : > { %v2060_v8 = vpop.permute.xlu1 %2059  ;;  %v2427_v10 = vpop.permute.xlu0 %2426 }
 0xe19   : > { %v2425_v9 = vpop.permute.xlu1 %2424 }
 0xe1a   : > { %3878 = vmatmul.mubr.msk.f32.vlgmr.msra.gmra.mrb[12].mxu1 %vm340_vm1, %v4693_v53 }
 0xe1b   : > { %4104 = vmatpush3.bf16.xpose.msk.msra.mxu1 %vm4491_vm2, %v4099_v3  ;;  %3891 = vmatprep.mubr.msk.f32.mxu1 %vm340_vm1, %v2058_v5 }
 0xe1c   : > { %4111 = vmatprep.subr.msk.bf16.mxu1 %vm4491_vm2, %v4109_v7 }
 0xe22   : > { %3892 = vmatmul.mubr.msk.f32.vlgmr.msra.gmra.mrb[14].mxu1 %vm340_vm1, %v2060_v8 }
 0xe23   : > { %4114 = vmatpush3.bf16.xpose.msk.msra.mxu1 %vm4491_vm2, %v4109_v7  ;;  %3915 = vmatprep.mubr.msk.f32.mxu1 %vm340_vm1, %v2425_v9 }
 0xe2a   : > { %3916 = vmatmul.mubr.msk.f32.vlgmr.msra.gmra.mrb[16].mxu1 %vm340_vm1, %v2427_v10 }
 0xeed   : > { %v3879_v11 = vpop.f32.mrb[12].mxu1 }
 0xeee   : > { %v1944_v12 = vmul.f32 0.35355338, %v3879_v11  ;;  %v1934_v13 = vpop.f32.mrb[13].mxu1 }
 0xeef   : > { %v1943_v14 = vmul.f32 0.35355338, %v1934_v13 }
 0xef0   : > { %v1946_v19 = vadd.f32 %v1944_v12, %v4513_v63 }
 0xef1   : > { %v1945_v20 = vadd.f32 %v1943_v14, %v4513_v63 }
 0xef2   : > { %v1950_v21 = vsel %vm428_vm4, %v1946_v19, -inf }
 0xef3   : > { %1951 = vmax.xlane.f32.xlu0 %v1950_v21  ;;  %v1947_v22 = vsel %vm428_vm4, %v1945_v20, -inf }
 0xef4   : > { %1948 = vmax.xlane.f32.xlu1 %v1947_v22 }
 0xef5   : > { %v3893_v23 = vpop.f32.mrb[14].mxu1 }
 0xef6   : > { %v2139_v24 = vpop.f32.mrb[15].mxu1  ;;  %v2149_v17 = vmul.f32 0.35355338, %v3893_v23 }
 0xef7   : > { %v2148_v1 = vmul.f32 0.35355338, %v2139_v24 }
 0xef8   : > { %v2151_v25 = vadd.f32 %v2149_v17, %v4513_v63 }
 0xef9   : > { %v2150_v18 = vadd.f32 %v2148_v1, %v4513_v63 }
 0xefa   : > { %v2155_v28 = vsel %vm428_vm4, %v2151_v25, -inf }
 0xefb   : > { %v2152_v0 = vsel %vm428_vm4, %v2150_v18, -inf }
 0xefc   : > { %2153 = vmax.xlane.f32.xlu0 %v2152_v0 }
 0xefd   : > { %v3917_v26 = vpop.f32.mrb[16].mxu1 }
 0xefe   : > { %v2506_v27 = vpop.f32.mrb[17].mxu1  ;;  %v2516_v54 = vmul.f32 0.35355338, %v3917_v26 }
 0xeff   : > { %v2515_v38 = vmul.f32 0.35355338, %v2506_v27 }
 0xf00   : > { %2156 = vmax.xlane.f32.xlu0 %v2155_v28  ;;  %v2518_v58 = vadd.f32 %v2516_v54, %v4513_v63 }
 0xf01   : > { %v2517_v52 = vadd.f32 %v2515_v38, %v4513_v63 }
 0xf02   : > { %v2522_v59 = vsel %vm428_vm4, %v2518_v58, -inf }
 0xf03   : > { %v2519_v57 = vsel %vm428_vm4, %v2517_v52, -inf }
 0xf80   : > { %v1952_v29 = vpop.xlane.xlu0 %1951 }
 0xf81   : > { %v1954_v30 = vsub.f32 %v1946_v19, %v1952_v29  ;;  %v1949_v31 = vpop.xlane.xlu1 %1948 }
 0xf82   : > { %v1953_v32 = vsub.f32 %v1945_v20, %v1949_v31  ;;  %v3543_v31 = vld [vmem:[%s4925_s1 + $0xc8] sm:$0xff] }
 0xf83   : > { %v1957_v33 = vmul.f32 1.442695, %v1954_v30 }
 0xf84   : > { %v1955_v34 = vmul.f32 1.442695, %v1953_v32  ;;  %v3536_v32 = vld [vmem:[%s4925_s1 + $0xc0] sm:$0xff] }
 0xf85   : > { %4330 = vpow2.f32 %v1957_v33 }
 0xf86   : > { %4332 = vpow2.f32 %v1955_v34 }
 0xf89   : > { %v2154_v35 = vpop.xlane.xlu0 %2153 }
 0xf8a   : > { %v2158_v36 = vsub.f32 %v2150_v18, %v2154_v35 }
 0xf8c   : > { %v2160_v37 = vmul.f32 1.442695, %v2158_v36 }
 0xf8d   : > { %v2157_v39 = vpop.xlane.xlu0 %2156 }
 0xf8e   : > { %4334 = vpow2.f32 %v2160_v37  ;;  %v2159_v42 = vsub.f32 %v2151_v25, %v2157_v39 }
 0xf8f   : > { %v4331_v43 = vpop.eup %4330 }
 0xf90   : > { %v4333_v44 = vpop.eup %4332  ;;  %v2162_v45 = vmul.f32 1.442695, %v2159_v42  ;;  %v1962_v46 = vsel %vm428_vm4, %v4331_v43, 0.0 }
 0xf91   : > { %1963 = vadd.xlane.f32.xlu0 %v1962_v46  ;;  %v1959_v47 = vsel %vm428_vm4, %v4333_v44, 0.0 }
 0xf92   : > { %4336 = vpow2.f32 %v2162_v45  ;;  %1960 = vadd.xlane.f32.xlu1 %v1959_v47 }
 0xf98   : > { %v4335_v40 = vpop.eup %4334 }
 0xf99   : > { %v2164_v49 = vsel %vm428_vm4, %v4335_v40, 0.0 }
 0xf9a   : > { %2165 = vadd.xlane.f32.xlu1 %v2164_v49 }
 0xf9c   : > { %v4337_v50 = vpop.eup %4336 }
 0xf9d   : > { %v2167_v51 = vsel %vm428_vm4, %v4337_v50, 0.0 }
 0xf9e   : > { %2168 = vadd.xlane.f32.xlu0 %v2167_v51 }
 0xfab   : > { %4262 = vrot.lane.b32.xlu1 %v4701_v56, %s4382_s14 }
 0xfaf   : > { %4272 = vrot.lane.b32.xlu1 %v4701_v56, %s4383_s17 }
 0xfb3   : > { %2712 = vrot.lane.b32.xlu1 %v4695_v55, %s4384_s18 }
 0xfb4   : > { %4267 = vrot.lane.b32.xlu0 %v4701_v56, %s4385_s19 }
 0xfb7   : > { %2714 = vrot.lane.b32.xlu1 %v4693_v53, %s4384_s18 }
 0xfd3   : > { %2520 = vmax.xlane.f32.xlu0 %v2519_v57 }
 0xfdb   : > { %2523 = vmax.xlane.f32.xlu1 %v2522_v59 }
0x101e   : > { %v1964_v55 = vpop.xlane.xlu0 %1963 }
0x101f   : > { %v1961_v60 = vpop.xlane.xlu1 %1960 }
0x1020   : > { %4338 = vrcp.f32 %v1961_v60  ;;  %v3554_v60 = vld [vmem:[%s4925_s1 + $0xd0] sm:$0xff] }
0x1021   : > { %4340 = vrcp.f32 %v1964_v55 }
0x1027   : > { %v2166_v61 = vpop.xlane.xlu1 %2165 }
0x1028   : > { %4342 = vrcp.f32 %v2166_v61 }
0x102a   : > { %v4339_v62 = vpop.eup %4338 }
0x102b   : > { %v2169_v53 = vpop.xlane.xlu0 %2168  ;;  %v4263_v2 = vpop.permute.xlu1 %4262  ;;  %v1967_v3 = vmul.f32 %v4339_v62, %v4333_v44 }
0x102c   : > { %4344 = vrcp.f32 %v2169_v53  ;;  %v4265_v4 = vunpack.i.h.bf16 %v4263_v2  ;;  %v4264_v5 = vunpack.i.l.bf16 %v4263_v2  ;;  %v4341_v41 = vpop.eup %4340 }
0x102d   : > { %3884 = vmatprep.mubr.msk.f32.mxu0 %vm428_vm4, %v1967_v3  ;;  %v1968_v14 = vmul.f32 %v4341_v41, %v4331_v43 }
0x102e   : > { %v4095_v6 = vpack.c.bf16 %v4265_v4, %v4264_v5 }
0x102f   : > { %v4268_v7 = vpop.permute.xlu0 %4267  ;;  %v4273_v8 = vpop.permute.xlu1 %4272 }
0x1030   : > { %v4270_v9 = vunpack.i.h.bf16 %v4268_v7  ;;  %v4269_v10 = vunpack.i.l.bf16 %v4268_v7  ;;  %v4275_v11 = vunpack.i.h.bf16 %v4273_v8  ;;  %v4274_v12 = vunpack.i.l.bf16 %v4273_v8  ;;  %4096 = vmatprep.subr.bf16.mxu0 %v4095_v6 }
0x1031   : > { %4098 = vmatpush3.bf16.msra.mxu0 %v4095_v6 }
0x1032   : > { %v4343_v13 = vpop.eup %4342  ;;  %v4105_v19 = vpack.c.bf16 %v4270_v9, %v4269_v10  ;;  %v4119_v20 = vpack.c.bf16 %v4275_v11, %v4274_v12 }
0x1033   : > { %v2713_v21 = vpop.permute.xlu1 %2712  ;;  %v2172_v22 = vmul.f32 %v4343_v13, %v4335_v40 }
0x1034   : > { %3885 = vmatmul.mubr.msk.f32.vlgmr.msra.gmra.mrb[14].mxu0 %vm428_vm4, %v1968_v14  ;;  %4106 = vmatprep.subr.bf16.mxu0 %v4105_v19  ;;  %v3563_v14 = vld [vmem:[%s4925_s1 + $0xd8] sm:$0xff] }
0x1035   : > { %4121 = vmatprep.subr.msk.bf16.mxu1 %vm4491_vm2, %v4119_v20  ;;  %3934 = vmatprep.mubr.msk.f32.mxu1 %vm340_vm1, %v2713_v21 }
0x1036   : > { %v4345_v23 = vpop.eup %4344  ;;  %4108 = vmatpush3.bf16.msra.mxu0 %v4105_v19  ;;  %3898 = vmatprep.mubr.msk.f32.mxu0 %vm428_vm4, %v2172_v22 }
0x1037   : > { %v2173_v24 = vmul.f32 %v4345_v23, %v4337_v50  ;;  %4124 = vmatpush3.bf16.xpose.msk.msra.mxu1 %vm4491_vm2, %v4119_v20  ;;  %v2715_v17 = vpop.permute.xlu1 %2714  ;;  %3901 = vmatprep.subr.mxu0 %v3543_v31 }
0x1039   : > { %3899 = vmatmul.mubr.msk.f32.vlgmr.msra.gmra.mrb[16].mxu0 %vm428_vm4, %v2173_v24 }
0x103a   : > { %3902 = vmatpush3.msra.mxu0 %v3543_v31 }
0x103b   : > { %3906 = vmatprep.subr.mxu0 %v3536_v32 }
0x103e   : > { %3935 = vmatmul.mubr.msk.f32.vlgmr.msra.gmra.mrb[18].mxu1 %vm340_vm1, %v2715_v17  ;;  %v3567_v17 = vld [vmem:[%s4926_s2 + $0x9] ss:$0 sm:$0xff] }
0x1060   : > { %v2521_v1 = vpop.xlane.xlu0 %2520 }
0x1061   : > { %v2525_v18 = vsub.f32 %v2517_v52, %v2521_v1 }
0x1063   : > { %v2527_v26 = vmul.f32 1.442695, %v2525_v18 }
0x1068   : > { %v2524_v0 = vpop.xlane.xlu1 %2523 }
0x1069   : > { %v2526_v25 = vsub.f32 %v2518_v58, %v2524_v0 }
0x106b   : > { %v2529_v27 = vmul.f32 1.442695, %v2526_v25 }
0x106d   : > { %4346 = vpow2.f32 %v2529_v27 }
0x106e   : > { %4348 = vpow2.f32 %v2527_v26 }
0x1077   : > { %v4347_v28 = vpop.eup %4346 }
0x1078   : > { %v2534_v29 = vsel %vm428_vm4, %v4347_v28, 0.0  ;;  %v4349_v30 = vpop.eup %4348 }
0x1079   : > { %2535 = vadd.xlane.f32.xlu0 %v2534_v29  ;;  %v2531_v48 = vsel %vm428_vm4, %v4349_v30, 0.0 }
0x107d   : > { %2532 = vadd.xlane.f32.xlu0 %v2531_v48 }
0x1093   : > { %4277 = vrot.lane.b32.xlu0 %v4701_v56, %s4386_s24 }
0x1106   : > { %v2536_v33 = vpop.xlane.xlu0 %2535 }
0x1107   : > { %v3886_v34 = vpop.f32.mrb[14].mxu0 }
0x1108   : > { %v2047_v35 = vpop.f32.mrb[15].mxu0 }
0x110a   : > { %v2533_v36 = vpop.xlane.xlu0 %2532 }
0x110b   : > { %4350 = vrcp.f32 %v2533_v36  ;;  %v3572_v36 = vld [vmem:[%s4925_s1 + $0xe0] sm:$0xff] }
0x110c   : > { %4352 = vrcp.f32 %v2536_v33  ;;  %v3900_v37 = vpop.f32.mrb[16].mxu0 }
0x110d   : > { %v2252_v39 = vpop.f32.mrb[17].mxu0 }
0x110e   : > { %v4278_v42 = vpop.permute.xlu0 %4277  ;;  %3903 = vmatprep.mubr.msk.f32.mxu0 %vm340_vm1, %v2252_v39 }
0x110f   : > { %v4280_v43 = vunpack.i.h.bf16 %v4278_v42  ;;  %v4279_v44 = vunpack.i.l.bf16 %v4278_v42  ;;  %3904 = vmatmul.mubr.msk.f32.vlgmr.msra.gmra.mrb[18].mxu0 %vm340_vm1, %v3900_v37  ;;  %v3573_v37 = vld [vmem:[%s4925_s1 + $0xe8] sm:$0xff]  ;;  %v3574_v42 = vld [vmem:[%s4925_s1 + $0xf0] sm:$0xff] }
0x1110   : > { %3908 = vmatprep.mubr.msk.f32.mxu0 %vm340_vm1, %v2047_v35  ;;  %3907 = vmatpush3.msra.mxu0 %v3536_v32  ;;  %v4129_v39 = vpack.c.bf16 %v3573_v37, %v3572_v36  ;;  %v3331_v36 = vld [vmem:[%s4927_s3 + $0x58] sm:$0xff] }
0x1111   : > { %v4115_v45 = vpack.c.bf16 %v4280_v43, %v4279_v44  ;;  %v3936_v46 = vpop.f32.mrb[18].mxu1  ;;  %v3575_v43 = vld [vmem:[%s4925_s1 + $0xf8] sm:$0xff] }
0x1112   : > { %v2794_v47 = vpop.f32.mrb[19].mxu1  ;;  %v2804_v40 = vmul.f32 0.35355338, %v3936_v46  ;;  %4130 = vmatprep.subr.bf16.mxu1 %v4129_v39  ;;  %v4133_v44 = vpack.c.bf16 %v3575_v43, %v3574_v42  ;;  %v3581_v46 = vld [vmem:[%s4925_s1 + $0x108] sm:$0xff] }
0x1113   : > { %v2803_v49 = vmul.f32 0.35355338, %v2794_v47  ;;  %4116 = vmatprep.subr.bf16.mxu0 %v4115_v45  ;;  %4132 = vmatpush3.bf16.msra.mxu1 %v4129_v39  ;;  %v3582_v47 = vld [vmem:[%s4925_s1 + $0x110] sm:$0xff]  ;;  %v3592_v39 = vld [vmem:[%s4927_s3 + $0x60] ss:$0 sm:$0xff] }
0x1114   : > { %v2806_v57 = vadd.f32 %v2804_v40, %v4513_v63  ;;  %4134 = vmatprep.subr.bf16.mxu1 %v4133_v44 }
0x1115   : > { %v4351_v50 = vpop.eup %4350  ;;  %v2805_v51 = vadd.f32 %v2803_v49, %v4513_v63  ;;  %v3583_v49 = vld [vmem:[%s4925_s1 + $0x118] sm:$0xff] }
0x1116   : > { %v4353_v38 = vpop.eup %4352  ;;  %v2539_v52 = vmul.f32 %v4351_v50, %v4349_v30  ;;  %v2810_v59 = vsel %vm428_vm4, %v2806_v57, -inf  ;;  %v4141_v50 = vpack.c.bf16 %v3583_v49, %v3582_v47 }
0x1117   : > { %v2807_v54 = vsel %vm428_vm4, %v2805_v51, -inf  ;;  %3909 = vmatmul.mubr.msk.f32.vlgmr.msra.gmra.mrb[18].mxu0 %vm340_vm1, %v3886_v34  ;;  %v2540_v58 = vmul.f32 %v4353_v38, %v4347_v28  ;;  %4136 = vmatpush3.bf16.msra.mxu1 %v4133_v44  ;;  %v3585_v38 = vld [vmem:[%s4925_s1 + $0x128] sm:$0xff] }
0x1118   : > { %2808 = vmax.xlane.f32.xlu1 %v2807_v54  ;;  %4118 = vmatpush3.bf16.msra.mxu0 %v4115_v45  ;;  %v3580_v45 = vld [vmem:[%s4925_s1 + $0x100] sm:$0xff] }
0x1119   : > { %3922 = vmatprep.mubr.msk.f32.mxu0 %vm428_vm4, %v2539_v52  ;;  %3925 = vmatprep.subr.mxu0 %v3554_v60  ;;  %v4137_v40 = vpack.c.bf16 %v3581_v46, %v3580_v45 }
0x111b   : > { %3923 = vmatmul.mubr.msk.f32.vlgmr.msra.gmra.mrb[20].mxu0 %vm428_vm4, %v2540_v58 }
0x111c   : > { %2811 = vmax.xlane.f32.xlu1 %v2810_v59  ;;  %3926 = vmatpush3.msra.mxu0 %v3554_v60 }
0x11a5   : > { %v2809_v55 = vpop.xlane.xlu1 %2808 }
0x11a6   : > { %v2813_v61 = vsub.f32 %v2805_v51, %v2809_v55  ;;  %v3584_v51 = vld [vmem:[%s4925_s1 + $0x120] sm:$0xff] }
0x11a7   : > { %v4145_v52 = vpack.c.bf16 %v3585_v38, %v3584_v51 }
0x11a8   : > { %v2815_v53 = vmul.f32 1.442695, %v2813_v61 }
0x11a9   : > { %v2812_v62 = vpop.xlane.xlu1 %2811 }
0x11aa   : > { %v2814_v63 = vsub.f32 %v2806_v57, %v2812_v62  ;;  %v3570_v62 = vld [vmem:[%s4926_s2 + $0xc] ss:$0 sm:$0xff] }
0x11ac   : > { %v2817_v2 = vmul.f32 1.442695, %v2814_v63 }
0x11ae   : > { %4354 = vpow2.f32 %v2817_v2 }
0x11af   : > { %4356 = vpow2.f32 %v2815_v53  ;;  %v3571_v53 = vld [vmem:[%s4926_s2 + $0xd] ss:$0 sm:$0xff] }
0x11b8   : > { %v4355_v3 = vpop.eup %4354 }
0x11b9   : > { %v2822_v4 = vsel %vm428_vm4, %v4355_v3, 0.0  ;;  %v4357_v5 = vpop.eup %4356 }
0x11ba   : > { %2823 = vadd.xlane.f32.xlu1 %v2822_v4  ;;  %v2819_v6 = vsel %vm428_vm4, %v4357_v5, 0.0 }
0x11be   : > { %2820 = vadd.xlane.f32.xlu1 %v2819_v6 }
0x11cf   : > { %4282 = vrot.lane.b32.xlu1 %v4701_v56, %s4387_s27 }
0x11ee   : > { %v3924_v41 = vpop.f32.mrb[20].mxu0 }
0x11ef   : > { %v2619_v7 = vpop.f32.mrb[21].mxu0 }
0x11f0   : > { %3927 = vmatprep.mubr.msk.f32.mxu0 %vm340_vm1, %v2619_v7  ;;  %v3586_v7 = vld [vmem:[%s4925_s1 + $0x130] sm:$0xff] }
0x11f1   : > { %3928 = vmatmul.mubr.msk.f32.vlgmr.msra.gmra.mrb[18].mxu0 %vm340_vm1, %v3924_v41 }
0x1247   : > { %v2824_v8 = vpop.xlane.xlu1 %2823 }
0x1248   : > { %4358 = vrcp.f32 %v2824_v8  ;;  %v3587_v8 = vld [vmem:[%s4925_s1 + $0x138] sm:$0xff] }
0x124b   : > { %v2821_v9 = vpop.xlane.xlu1 %2820 }
0x124c   : > { %4360 = vrcp.f32 %v2821_v9  ;;  %v4149_v9 = vpack.c.bf16 %v3587_v8, %v3586_v7 }
0x124f   : > { %v4283_v10 = vpop.permute.xlu1 %4282 }
0x1250   : > { %v4285_v11 = vunpack.i.h.bf16 %v4283_v10  ;;  %v4284_v12 = vunpack.i.l.bf16 %v4283_v10  ;;  %v3236_v10 = vld [vmem:[%s4927_s3] sm:$0xff] }
0x1252   : > { %v4125_v13 = vpack.c.bf16 %v4285_v11, %v4284_v12  ;;  %v4359_v56 = vpop.eup %4358  ;;  %v3237_v11 = vld [vmem:[%s4927_s3 + $0x8] sm:$0xff]  ;;  %v4388_v12 = vmov 0.0|0.0  }
0x1253   : > { %v2828_v21 = vmul.f32 %v4359_v56, %v4355_v3  ;;  %4153 = vmatprep.subr.bf16.mxu1 %v4388_v12 }
0x1254   : > { %4126 = vmatprep.subr.bf16.mxu0 %v4125_v13 }
0x1255   : > { %4128 = vmatpush3.bf16.msra.mxu0 %v4125_v13  ;;  %v4154_v13 = vpack.c.bf16 %v3237_v11, %v3236_v10 }
0x1256   : > { %v4361_v19 = vpop.eup %4360  ;;  %3944 = vmatprep.subr.mxu0 %v3563_v14 }
0x1257   : > { %v2827_v20 = vmul.f32 %v4361_v19, %v4357_v5 }
0x1259   : > { %3941 = vmatprep.mubr.msk.f32.mxu0 %vm428_vm4, %v2827_v20 }
0x125a   : > { %3942 = vmatmul.mubr.msk.f32.vlgmr.msra.gmra.mrb[22].mxu0 %vm428_vm4, %v2828_v21 }
0x125b   : > { %3945 = vmatpush3.msra.mxu0 %v3563_v14  ;;  %v3577_v14 = vld [vmem:[%s4926_s2 + $0xe] ss:$0 sm:$0xff] }
0x125c   : > { %4138 = vmatprep.subr.bf16.mxu0 %v4137_v40 }
0x132d   : > { %v3943_v22 = vpop.f32.mrb[22].mxu0 }
0x132e   : > { %v2907_v23 = vpop.f32.mrb[23].mxu0 }
0x132f   : > { %3946 = vmatprep.mubr.msk.f32.mxu0 %vm340_vm1, %v2907_v23 }
0x1330   : > { %3947 = vmatmul.mubr.msk.f32.vlgmr.msra.gmra.mrb[18].mxu0 %vm340_vm1, %v3943_v22 }
0x1331   : > { %4140 = vmatpush3.bf16.msra.mxu0 %v4137_v40 }
0x1332   : > { %4142 = vmatprep.subr.bf16.mxu0 %v4141_v50 }
0x1335   : > { %4144 = vmatpush3.bf16.msra.mxu0 %v4141_v50  ;;  %v3594_v50 = vld [vmem:[%s4927_s3 + $0x68] ss:$0 sm:$0xff] }
0x1336   : > { %4146 = vmatprep.subr.bf16.mxu0 %v4145_v52 }
0x1339   : > { %4148 = vmatpush3.bf16.msra.mxu0 %v4145_v52 }
0x133a   : > { %4150 = vmatprep.subr.bf16.mxu0 %v4149_v9 }
0x133d   : > { %4152 = vmatpush3.bf16.msra.mxu0 %v4149_v9 }
0x1403   : > { %v3948_v24 = vpop.f32.mrb[18].mxu0 }
0x1404   : > { %v3002_v1 = vadd.f32 %v3948_v24, %v4660_v16  ;;  %v2989_v18 = vpop.f32.mrb[19].mxu0  ;;  %v3238_v24 = vld [vmem:[%s4927_s3 + $0x10] sm:$0xff] }
0x1405   : > { %v3001_v0 = vadd.f32 %v2989_v18, %v4658_v15  ;;  %v4390_v18 = vmov 0.0  }
0x1406   : > { %v3008_v25 = vadd.f32 %v3567_v17, %v3002_v1 }
0x1407   : > { %v4812_v26 = vadd.f32 %v3567_v17, %v3001_v0  ;;  %v3239_v17 = vld [vmem:[%s4927_s3 + $0x18] sm:$0xff] }
0x1408   : > { %v3014_v27 = vsel %vm204_vm0, %v3008_v25, 0.0  ;;  %v4157_v1 = vpack.c.bf16 %v3239_v17, %v3238_v24 }
0x1409   : > { %3015 = vadd.xlane.f32.xlu1 %v3014_v27  ;;  %v3011_v28 = vsel %vm204_vm0, %v4812_v26, 0.0 }
0x140a   : > { %3012 = vadd.xlane.f32.xlu0 %v3011_v28 }
0x1496   : > { %v3016_v29 = vpop.xlane.xlu1 %3015 }
0x1497   : > { %v3018_v30 = vmul.f32 0.03125, %v3016_v29  ;;  %v3013_v48 = vpop.xlane.xlu0 %3012 }
0x1498   : > { %v3017_v31 = vmul.f32 0.03125, %v3013_v48  ;;  %v3325_v48 = vld [vmem:[%s4927_s3 + $0x28] sm:$0xff] }
0x1499   : > { %v3020_v32 = vsub.f32 %v3008_v25, %v3018_v30  ;;  %v3591_v25 = vld [vmem:[%s4926_s2 + $0xf] ss:$0 sm:$0xff]  ;;  %v3324_v30 = vld [vmem:[%s4927_s3 + $0x20] sm:$0xff] }
0x149a   : > { %v3019_v16 = vsub.f32 %v4812_v26, %v3017_v31  ;;  %v4160_v31 = vpack.c.bf16 %v3325_v48, %v3324_v30 }
0x149b   : > { %v3022_v34 = vmul.f32 %v3020_v32, %v3020_v32 }
0x149c   : > { %v3021_v33 = vmul.f32 %v3019_v16, %v3019_v16 }
0x149d   : > { %v3026_v35 = vsel %vm204_vm0, %v3022_v34, 0.0 }
0x149e   : > { %v3023_v15 = vsel %vm204_vm0, %v3021_v33, 0.0  ;;  %v3328_v33 = vld [vmem:[%s4927_s3 + $0x40] sm:$0xff] }
0x149f   : > { %3024 = vadd.xlane.f32.xlu0 %v3023_v15  ;;  %v3329_v15 = vld [vmem:[%s4927_s3 + $0x48] sm:$0xff] }
0x14a0   : > { %v4166_v34 = vpack.c.bf16 %v3329_v15, %v3328_v33 }
0x14a3   : > { %3027 = vadd.xlane.f32.xlu0 %v3026_v35  ;;  %v3330_v35 = vld [vmem:[%s4927_s3 + $0x50] sm:$0xff] }
0x14a4   : > { %v4169_v37 = vpack.c.bf16 %v3331_v36, %v3330_v35 }
0x152c   : > { %v3025_v54 = vpop.xlane.xlu0 %3024 }
0x152d   : > { %v3029_v57 = vmul.f32 0.03125, %v3025_v54 }
0x152f   : > { %v3031_v58 = vadd.f32 1e-05, %v3029_v57 }
0x1530   : > { %v3028_v59 = vpop.xlane.xlu0 %3027 }
0x1531   : > { %4362 = vrsqrt.f32 %v3031_v58  ;;  %v3030_v60 = vmul.f32 0.03125, %v3028_v59 }
0x1533   : > { %v3032_v55 = vadd.f32 1e-05, %v3030_v60 }
0x1535   : > { %4364 = vrsqrt.f32 %v3032_v55 }
0x153b   : > { %v4363_v61 = vpop.eup %4362 }
0x153c   : > { %v3035_v63 = vmul.f32 %v4363_v61, %v3019_v16 }
0x153e   : > { %v3041_v2 = vmul.f32 %v3570_v62, %v3035_v63 }
0x153f   : > { %v4365_v3 = vpop.eup %4364 }
0x1540   : > { %v3036_v4 = vmul.f32 %v4365_v3, %v3020_v32  ;;  %v3047_v5 = vadd.f32 %v3571_v53, %v3041_v2  ;;  %v3326_v32 = vld [vmem:[%s4927_s3 + $0x30] sm:$0xff] }
0x1542   : > { %v3042_v6 = vmul.f32 %v3570_v62, %v3036_v4  ;;  %3957 = vmatprep.mubr.msk.f32.mxu1 %vm204_vm0, %v3047_v5 }
0x1544   : > { %v3048_v41 = vadd.f32 %v3571_v53, %v3042_v6 }
0x1546   : > { %3958 = vmatmul.mubr.msk.f32.vlgmr.msra.gmra.mrb[20].mxu1 %vm204_vm0, %v3048_v41 }
0x1547   : > { %4155 = vmatpush3.bf16.msra.mxu1 %v4154_v13  ;;  %3987 = vmatprep.mubr.msk.f32.mxu1 %vm4389_vm6, %v4390_v18 }
0x1548   : > { %4156 = vmatprep.subr.bf16.mxu1 %v4388_v12 }
0x154b   : > { %4158 = vmatpush3.bf16.msra.mxu1 %v4157_v1 }
0x154c   : > { %4159 = vmatprep.subr.bf16.mxu1 %v4388_v12 }
0x1619   : > { %v3959_v56 = vpop.f32.mrb[20].mxu1 }
0x161a   : > { %v3136_v19 = vadd.f32 %v3959_v56, %v3577_v14  ;;  %v3130_v20 = vpop.f32.mrb[21].mxu1 }
0x161b   : > { %v3131_v21 = vadd.f32 %v3577_v14, %v3130_v20 }
0x161c   : > { %v3140_v23 = vmax.f32 %v3136_v19, 0.0 }
0x161d   : > { %v3139_v22 = vmax.f32 %v3131_v21, 0.0 }
0x161f   : > { %3976 = vmatprep.mubr.msk.f32.mxu0 %vm1632_vm5, %v3139_v22 }
0x1620   : > { %3977 = vmatmul.mubr.msk.f32.vlgmr.msra.gmra.mrb[24].mxu0 %vm1632_vm5, %v3140_v23 }
0x16f3   : > { %v3978_v0 = vpop.f32.mrb[24].mxu0 }
0x16f4   : > { %v3222_v27 = vpop.f32.mrb[25].mxu0 }
0x16f5   : > { %v3230_v28 = vadd.f32 %v3222_v27, %v4812_v26  ;;  %v3327_v26 = vld [vmem:[%s4927_s3 + $0x38] sm:$0xff] }
0x16f6   : > { %v4163_v16 = vpack.c.bf16 %v3327_v26, %v3326_v32 }
0x16f7   : > { %v3235_v29 = vadd.f32 %v3591_v25, %v3230_v28 }
0x16f9   : > { %3988 = vmatmul.mubr.msk.f32.vlgmr.msra.gmra.mrb[22].mxu1 %vm204_vm0, %v3235_v29 }
0x16fa   : > { %4006 = vmatprep.mubr.msk.f32.mxu1 %vm4389_vm6, %v4390_v18  ;;  %4161 = vmatpush3.bf16.msra.mxu1 %v4160_v31 }
0x16fb   : > { %4162 = vmatprep.subr.bf16.mxu1 %v4388_v12 }
0x16fe   : > { %4164 = vmatpush3.bf16.msra.mxu1 %v4163_v16 }
0x16ff   : > { %4165 = vmatprep.subr.bf16.mxu1 %v4388_v12 }
0x1702   : > { %4167 = vmatpush3.bf16.msra.mxu1 %v4166_v34 }
0x1703   : > { %4168 = vmatprep.subr.bf16.mxu1 %v4388_v12 }
0x1706   : > { %4170 = vmatpush3.bf16.msra.mxu1 %v4169_v37 }
0x17cc   : > { %v3314_v42 = vpop.f32.mrb[22].mxu1 }
0x17cd   : > { %v3315_v43 = vadd.f32 %v3592_v39, %v3314_v42  ;;  %v3989_v44 = vpop.f32.mrb[23].mxu1 }
0x17cf   : > { %v3320_v45 = vmul.f32 0.70710677, %v3315_v43  ;;  %v3318_v47 = vmul.f32 0.5, %v3315_v43 }
0x17d1   : > { %4366 = verf.f32 %v3320_v45 }
0x17db   : > { %v4367_v46 = vpop.eup %4366 }
0x17dc   : > { %v3322_v40 = vadd.f32 1.0, %v4367_v46 }
0x17de   : > { %v3323_v49 = vmul.f32 %v3322_v40, %v3318_v47 }
0x17e0   : > { %4007 = vmatmul.mubr.msk.f32.vlgmr.msra.gmra.mrb[24].mxu1 %vm1632_vm5, %v3323_v49 }
0x18b3   : > { %v3406_v51 = vpop.f32.mrb[24].mxu1 }
0x18b4   : > { %v3407_v38 = vadd.f32 %v3594_v50, %v3406_v51  ;;  %v4008_v52 = vpop.f32.mrb[25].mxu1 }
0x18b6   : > { %3410 = vst [vmem:[%s195_s10] sm:$0xff] %v3407_v38 }
0x18b7 PF: > { %s14_s15 = sadd.s32 1, %s4374_s15  }
0x18b8   : > { %p11_p4 = scmp.ge.s32.totalorder %s14_s15, 4  }
0x18ba   :  { %13 = sbr.rel (!%p11_p4) target bundleno = 1 (0x1), region = 68 }

</bundles_post_ra>
